<compile_context>
chip_gen: v7x
topology: tpu7x:2x2x1
jax: 0.10.0
libtpu: 0.0.40
codegen_flags: <defaults>
</compile_context>

<pallas_src>
import functools

import jax
import jax.numpy as jnp
from jax import lax
from jax.experimental import pallas as pl
from jax.experimental.pallas import tpu as pltpu

BN_EPS = 1e-5


def _pick_tv_tile(TV, max_tile=2048):
    """Largest multiple-of-128 divisor of TV (<= max_tile), else the full TV."""
    best = TV
    for cand in range(128, min(max_tile, TV) + 1, 128):
        if TV % cand == 0:
            best = cand
    return best


# --------------------- pass 1: conv_a / conv_b projections (conv layout, TV-tiled) ---------------------
def _qk_kernel(x_ref, wa_ref, ba_ref, wb_ref, bb_ref, fa_ref, fb_ref):
    x = x_ref[0]                                                    # (C_in, tv) bf16, lane-dense
    # one dot per output ref -> no packed slab, no misaligned slices
    fa = jnp.dot(wa_ref[...], x, preferred_element_type=jnp.float32) + ba_ref[...]
    fb = jnp.dot(wb_ref[...], x, preferred_element_type=jnp.float32) + bb_ref[...]
    fa_ref[0] = fa.astype(jnp.bfloat16)
    fb_ref[0] = fb.astype(jnp.bfloat16)


# --------------------- pass 2: adaptive attention + graph aggregation (graph layout) -------------------
def _attn_agg_kernel(fa_ref, fb_ref, x_ref, adj_ref, beta_ref, agg_ref, *, ns, icT, cinT):
    inv_logit = 1.0 / float(icT)
    x_g = x_ref[0]                                                  # (C_in*T, V) bf16
    for i in range(ns):                                             # ns = 3, static unroll
        fai = fa_ref[0, i * icT:(i + 1) * icT, :]                   # (ic*T, V) bf16
        fbi = fb_ref[0, i * icT:(i + 1) * icT, :]
        # attention logits: contract over (inter_c, T) -> (V, V), f32 accumulate
        m = lax.dot_general(fai, fbi, (((0,), (0,)), ((), ())),
                            preferred_element_type=jnp.float32) * inv_logit
        m = m - jnp.max(m, axis=0, keepdims=True)                   # nn.Softmax(-2): contracted rows
        e = jnp.exp(m)
        att = e * pl.reciprocal(jnp.sum(e, axis=0, keepdims=True), approx=True)
        a1 = (beta_ref[0, i:i + 1, :] * att + adj_ref[i]).astype(jnp.bfloat16)   # (V, V)
        # per-subset aggregation kept as separate dots to bound the f32 accumulator VMEM
        # (the heavy, well-shaped matmul is the fused K = ns*C_in projection in pass 3)
        agg_ref[0, i * cinT:(i + 1) * cinT, :] = jnp.dot(
            x_g, a1, preferred_element_type=jnp.float32).astype(jnp.bfloat16)


# --------------- pass 3: conv_d projection + BN/SE affine + residual + ReLU (conv layout, TV-tiled) ----
def _finalize_kernel(*refs, has_down):
    if has_down:
        agg_ref, x_ref, wdp_ref, p_ref, wdn_ref, gd_ref, bd_ref, o_ref = refs
    else:
        agg_ref, x_ref, wdp_ref, p_ref, o_ref = refs
    # fused conv_d: one lane-dense matmul, K = ns*C_in
    z = jnp.dot(wdp_ref[...], agg_ref[0], preferred_element_type=jnp.float32)     # (C_out, tv)
    # p[:, 0] = bn_scale*se, p[:, 1] = bn_shift*se  (per-sample, precomputed in XLA glue)
    y = p_ref[0, :, 0:1] * z + p_ref[0, :, 1:2]
    if has_down:
        d = jnp.dot(wdn_ref[...], x_ref[0].astype(jnp.bfloat16),
                    preferred_element_type=jnp.float32)
        resid = gd_ref[...] * d + bd_ref[...]
    else:
        resid = x_ref[0]
    o_ref[0] = jnp.maximum(y + resid, 0.0).astype(o_ref.dtype)


# ----------------------------------------------- wrapper -----------------------------------------------
def unit_gcn_forward(x, params, *, num_subset=3, eps=BN_EPS):
    """x: (N, C_in, T, V) float32 (NCHW as in torch). Returns (N, C_out, T, V)."""
    N, Cin, T, V = x.shape
    ns = num_subset
    f32, bf16 = jnp.float32, jnp.bfloat16
    wa, ba = params["wa"], params["ba"]              # (ns, ic, C_in), (ns, ic)
    wb, bb = params["wb"], params["bb"]
    wc, bc = params["wc"], params["bc"]              # (ns, C_in), (ns,)
    wd = params["wd"]                                # (ns, C_out, C_in)
    ic = wa.shape[1]
    Cout = wd.shape[1]
    TV = T * V
    has_down = Cin != Cout

    x2 = x.reshape(N, Cin, TV).astype(f32)           # lane-dense tokens: T*V in the lane dim
    x_bf = x2.astype(bf16)                           # bf16 copy for all MXU operands
    tv = _pick_tv_tile(TV)
    J = TV // tv

    # ------------------------------- pass 1: conv_a / conv_b -------------------------------
    wa_p = wa.reshape(ns * ic, Cin).astype(bf16)
    wb_p = wb.reshape(ns * ic, Cin).astype(bf16)
    ba_p = ba.reshape(ns * ic, 1).astype(f32)
    bb_p = bb.reshape(ns * ic, 1).astype(f32)
    par_nj = pltpu.CompilerParams(dimension_semantics=("parallel", "parallel"))
    fa, fb = pl.pallas_call(
        _qk_kernel,
        grid=(N, J),
        in_specs=[pl.BlockSpec((1, Cin, tv), lambda n, j: (n, 0, j)),
                  pl.BlockSpec((ns * ic, Cin), lambda n, j: (0, 0)),
                  pl.BlockSpec((ns * ic, 1), lambda n, j: (0, 0)),
                  pl.BlockSpec((ns * ic, Cin), lambda n, j: (0, 0)),
                  pl.BlockSpec((ns * ic, 1), lambda n, j: (0, 0))],
        out_specs=[pl.BlockSpec((1, ns * ic, tv), lambda n, j: (n, 0, j)),
                   pl.BlockSpec((1, ns * ic, tv), lambda n, j: (n, 0, j))],
        out_shape=[jax.ShapeDtypeStruct((N, ns * ic, TV), bf16),
                   jax.ShapeDtypeStruct((N, ns * ic, TV), bf16)],
        compiler_params=par_nj,
    )(x_bf, wa_p, ba_p, wb_p, bb_p)

    # conv_c collapses to a scalar per (sample, subset): beta_i = wc_i . mean_TV(x) + bc_i  (XLA glue)
    beta_att = (jnp.mean(x2, axis=2) @ wc.T.astype(f32) + bc.astype(f32))[:, :, None]   # (N, ns, 1)
    adj = (params["A"] + 0.5 * params["PA"]).astype(f32)                                # (ns, V, V)

    # free re-views: (N, R, T*V) <-> (N, R*T, V) is the identical memory layout
    fa_g = fa.reshape(N, ns * ic * T, V)
    fb_g = fb.reshape(N, ns * ic * T, V)
    x_g = x_bf.reshape(N, Cin * T, V)

    # ------------------------------- pass 2: attention + aggregation -------------------------------
    agg = pl.pallas_call(
        functools.partial(_attn_agg_kernel, ns=ns, icT=ic * T, cinT=Cin * T),
        grid=(N,),
        in_specs=[pl.BlockSpec((1, ns * ic * T, V), lambda n: (n, 0, 0)),
                  pl.BlockSpec((1, ns * ic * T, V), lambda n: (n, 0, 0)),
                  pl.BlockSpec((1, Cin * T, V), lambda n: (n, 0, 0)),
                  pl.BlockSpec((ns, V, V), lambda n: (0, 0, 0)),
                  pl.BlockSpec((1, ns, 1), lambda n: (n, 0, 0))],
        out_specs=pl.BlockSpec((1, ns * Cin * T, V), lambda n: (n, 0, 0)),
        out_shape=jax.ShapeDtypeStruct((N, ns * Cin * T, V), bf16),
        compiler_params=pltpu.CompilerParams(dimension_semantics=("parallel",),
                                             vmem_limit_bytes=64 * 1024 * 1024),
    )(fa_g, fb_g, x_g, adj, beta_att)

    agg_c = agg.reshape(N, ns * Cin, TV)             # free re-view, conv layout

    # ---------------- XLA glue: BN statistics + SE scales (global over N -> cannot live in the grid) ---
    wdp_f = wd.transpose(1, 0, 2).reshape(Cout, ns * Cin).astype(f32)
    wdp_bf = wdp_f.astype(bf16)
    wdp_use = wdp_bf.astype(f32)                     # keep stats consistent with the kernel's operand
    aggsum = jnp.sum(agg_c, axis=2, dtype=f32)                                   # (N, ns*Cin)
    mom2 = jnp.einsum("nip,njp->nij", agg_c, agg_c, preferred_element_type=f32)  # (N, ns*Cin, ns*Cin)
    zsum = jnp.einsum("nc,oc->no", aggsum, wdp_use)                              # per-sample sum_{T,V} z
    zsq = jnp.einsum("oc,ncd,od->no", wdp_use, mom2, wdp_use)                    # per-sample sum z^2
    cnt = float(N * TV)
    mean_z = jnp.sum(zsum, axis=0) / cnt
    var_z = jnp.maximum(jnp.sum(zsq, axis=0) / cnt - mean_z * mean_z, 0.0)
    scale_z = params["gamma"].astype(f32) * lax.rsqrt(var_z + eps)
    shift_z = params["beta"].astype(f32) - mean_z * scale_z
    # SE: pool of the post-BN map == affine of the pre-BN per-sample pool
    pooled = scale_z[None, :] * (zsum / float(TV)) + shift_z[None, :]            # (N, C_out)
    h = jnp.maximum(pooled @ params["w1"].astype(f32).T, 0.0)
    s = jax.nn.sigmoid(h @ params["w2"].astype(f32).T)                           # (N, C_out)
    P = jnp.stack([scale_z[None, :] * s, shift_z[None, :] * s], axis=-1).astype(f32)  # (N, C_out, 2)

    ins3 = [agg_c, x2, wdp_bf, P]
    specs3 = [pl.BlockSpec((1, ns * Cin, tv), lambda n, j: (n, 0, j)),
              pl.BlockSpec((1, Cin, tv), lambda n, j: (n, 0, j)),
              pl.BlockSpec((Cout, ns * Cin), lambda n, j: (0, 0)),
              pl.BlockSpec((1, Cout, 2), lambda n, j: (n, 0, 0))]
    if has_down:
        # down-path BN statistics derived analytically from x's moments -> d never hits HBM
        wdn_bf = params["w_down"].astype(bf16)
        wdn_use = wdn_bf.astype(f32)
        xsum_t = jnp.sum(x_bf, axis=(0, 2), dtype=f32)                           # (C_in,)
        xmom = jnp.einsum("ncp,ndp->cd", x_bf, x_bf, preferred_element_type=f32)  # (C_in, C_in)
        dsum = wdn_use @ xsum_t
        dsq = jnp.einsum("oc,cd,od->o", wdn_use, xmom, wdn_use)
        mean_d = dsum / cnt
        var_d = jnp.maximum(dsq / cnt - mean_d * mean_d, 0.0)
        scale_d = params["gamma_down"].astype(f32) * lax.rsqrt(var_d + eps)
        shift_d = params["beta_down"].astype(f32) - mean_d * scale_d
        ins3 += [wdn_bf, scale_d.reshape(Cout, 1), shift_d.reshape(Cout, 1)]
        specs3 += [pl.BlockSpec((Cout, Cin), lambda n, j: (0, 0)),
                   pl.BlockSpec((Cout, 1), lambda n, j: (0, 0)),
                   pl.BlockSpec((Cout, 1), lambda n, j: (0, 0))]

    # ------------------------------- pass 3: project + BN/SE + residual + ReLU -------------------------
    out = pl.pallas_call(
        functools.partial(_finalize_kernel, has_down=has_down),
        grid=(N, J),
        in_specs=specs3,
        out_specs=pl.BlockSpec((1, Cout, tv), lambda n, j: (n, 0, j)),
        out_shape=jax.ShapeDtypeStruct((N, Cout, TV), x.dtype),
        compiler_params=par_nj,
    )(*ins3)
    return out.reshape(N, Cout, T, V)


# ------------------------------ pure-JAX reference (NCHW, all f32) --------------------------------
def unit_gcn_reference(x, p, *, num_subset=3, eps=BN_EPS):
    N, C, T, V = x.shape
    ic = p["wa"].shape[1]
    Cout = p["wd"].shape[1]
    A = p["A"] + 0.5 * p["PA"]
    xf = x.reshape(N, C * T, V)
    y = None
    for i in range(num_subset):
        fa = jnp.einsum("oc,nctv->notv", p["wa"][i], x) + p["ba"][i][None, :, None, None]
        fb = jnp.einsum("oc,nctv->notv", p["wb"][i], x) + p["bb"][i][None, :, None, None]
        A1 = jnp.transpose(fa, (0, 3, 1, 2)).reshape(N, V, ic * T)
        A2 = fb.reshape(N, ic * T, V)
        att = jax.nn.softmax(jnp.matmul(A1, A2) / (ic * T), axis=-2)
        cvals = jnp.einsum("c,nctv->ntv", p["wc"][i], x) + p["bc"][i]
        beta = jnp.mean(cvals, axis=(1, 2))[:, None, None]
        A1f = beta * att + A[i]
        agg = jnp.matmul(xf, A1f).reshape(N, C, T, V)
        z = jnp.einsum("oc,nctv->notv", p["wd"][i], agg) + p["bd"][i][None, :, None, None]
        y = z if y is None else y + z
    mu = jnp.mean(y, axis=(0, 2, 3), keepdims=True)
    var = jnp.mean((y - mu) ** 2, axis=(0, 2, 3), keepdims=True)
    yb = p["gamma"][None, :, None, None] * (y - mu) * lax.rsqrt(var + eps) \
        + p["beta"][None, :, None, None]
    pooled = jnp.mean(yb, axis=(2, 3))
    h = jnp.maximum(pooled @ p["w1"].T, 0.0)
    s = jax.nn.sigmoid(h @ p["w2"].T)
    yse = yb * s[:, :, None, None]
    if C != Cout:
        d = jnp.einsum("oc,nctv->notv", p["w_down"], x) + p["b_down"][None, :, None, None]
        mu_d = jnp.mean(d, axis=(0, 2, 3), keepdims=True)
        var_d = jnp.mean((d - mu_d) ** 2, axis=(0, 2, 3), keepdims=True)
        resid = p["gamma_down"][None, :, None, None] * (d - mu_d) * lax.rsqrt(var_d + eps) \
            + p["beta_down"][None, :, None, None]
    else:
        resid = x
    return jnp.maximum(yse + resid, 0.0)


def make_params(key, in_channels, out_channels, V, *, num_subset=3, coff_embedding=4, reduction=4):
    """Deterministic synthetic parameters with module-like shapes (non-degenerate test values)."""
    ic = out_channels // coff_embedding
    ks = jax.random.split(key, 16)
    p = {}
    p["wa"] = jax.random.normal(ks[0], (num_subset, ic, in_channels), jnp.float32) * (2.0 / ic) ** 0.5
    p["ba"] = 0.1 * jax.random.normal(ks[1], (num_subset, ic), jnp.float32)
    p["wb"] = jax.random.normal(ks[2], (num_subset, ic, in_channels), jnp.float32) * (2.0 / ic) ** 0.5
    p["bb"] = 0.1 * jax.random.normal(ks[3], (num_subset, ic), jnp.float32)
    p["wc"] = jax.random.normal(ks[4], (num_subset, in_channels), jnp.float32) * 2.0 ** 0.5
    p["bc"] = 0.1 * jax.random.normal(ks[5], (num_subset,), jnp.float32)
    p["wd"] = jax.random.normal(ks[6], (num_subset, out_channels, in_channels), jnp.float32) \
        * (2.0 / (out_channels * in_channels * num_subset)) ** 0.5
    p["bd"] = 0.1 * jax.random.normal(ks[7], (num_subset, out_channels), jnp.float32)
    p["A"] = jax.random.uniform(ks[8], (num_subset, V, V), jnp.float32)
    p["PA"] = 1e-2 * jax.random.normal(ks[9], (num_subset, V, V), jnp.float32)
    p["gamma"] = 1.0 + 0.1 * jax.random.normal(ks[10], (out_channels,), jnp.float32)
    p["beta"] = 0.1 * jax.random.normal(ks[11], (out_channels,), jnp.float32)
    cm = max(1, out_channels // reduction)
    p["w1"] = jax.random.normal(ks[12], (cm, out_channels), jnp.float32) / out_channels ** 0.5
    p["w2"] = jax.random.normal(ks[13], (out_channels, cm), jnp.float32) / cm ** 0.5
    if in_channels != out_channels:
        p["w_down"] = jax.random.normal(ks[14], (out_channels, in_channels), jnp.float32) \
            * (2.0 / out_channels) ** 0.5
        p["b_down"] = 0.1 * jax.random.normal(ks[15], (out_channels,), jnp.float32)
        p["gamma_down"] = 1.0 + 0.1 * jax.random.normal(ks[14], (out_channels,), jnp.float32)
        p["beta_down"] = 0.1 * jax.random.normal(ks[15], (out_channels,), jnp.float32)
    return p


if __name__ == "__main__":
    N, C_IN, C_OUT, T, V = 2, 4, 16, 16, 8
    NS = 3

    key = jax.random.PRNGKey(0)
    kx, kp = jax.random.split(key)
    x = jax.random.normal(kx, (N, C_IN, T, V), jnp.float32)          # (N, C, T, V)
    params = make_params(kp, C_IN, C_OUT, V, num_subset=NS)

    fwd = jax.jit(functools.partial(unit_gcn_forward, num_subset=NS))

    # Tolerances: kernel uses bf16 MXU operands / bf16 HBM intermediates (f32 accumulation),
    # the reference is pure f32 -> expected max-abs error O(1e-2) after BN.
    MAX_TOL, MEAN_TOL = 5e-2, 1e-2

    out = jax.block_until_ready(fwd(x, params))
    ref = unit_gcn_reference(x, params, num_subset=NS)
    assert out.shape == ref.shape == (N, C_OUT, T, V), (out.shape, ref.shape)
    err = float(jnp.max(jnp.abs(out - ref)))
    merr = float(jnp.mean(jnp.abs(out - ref)))
    assert err < MAX_TOL and merr < MEAN_TOL, f"mismatch (down path): max={err} mean={merr}"

    # identity-residual case (in_channels == out_channels -> self.down is a lambda x: x)
    x_id = jax.random.normal(jax.random.PRNGKey(2), (N, C_OUT, T, V), jnp.float32)
    params_id = make_params(jax.random.PRNGKey(1), C_OUT, C_OUT, V, num_subset=NS)
    out_id = jax.block_until_ready(fwd(x_id, params_id))
    ref_id = unit_gcn_reference(x_id, params_id, num_subset=NS)
    err_id = float(jnp.max(jnp.abs(out_id - ref_id)))
    merr_id = float(jnp.mean(jnp.abs(out_id - ref_id)))
    assert err_id < MAX_TOL and merr_id < MEAN_TOL, \
        f"mismatch (identity path): max={err_id} mean={merr_id}"

    print("KERNEL_OK")
</pallas_src>

<mosaic_0001>
module attributes {stable_mosaic.version = 11 : i64} {
  func.func @_qk_kernel(%arg0: i32, %arg1: i32, %arg2: memref<1x4x128xbf16, #tpu.memory_space<vmem>>, %arg3: memref<12x4xbf16, #tpu.memory_space<vmem>>, %arg4: memref<12x1xf32, #tpu.memory_space<vmem>>, %arg5: memref<12x4xbf16, #tpu.memory_space<vmem>>, %arg6: memref<12x1xf32, #tpu.memory_space<vmem>>, %arg7: memref<1x12x128xbf16, #tpu.memory_space<vmem>>, %arg8: memref<1x12x128xbf16, #tpu.memory_space<vmem>>) attributes {dimension_semantics = [#tpu.dimension_semantics<parallel>, #tpu.dimension_semantics<parallel>], iteration_bounds = array<i64: 2, 1>, scalar_prefetch = 0 : i64, scratch_operands = 0 : i64, tpu.core_type = #tpu.core_type<tc>, window_params = [{transform_indices = @transform_0, window_bounds = array<i64: 1, 4, 128>}, {pipeline_mode = #tpu.pipeline_mode<synchronous>, transform_indices = @transform_1, window_bounds = array<i64: 12, 4>}, {pipeline_mode = #tpu.pipeline_mode<synchronous>, transform_indices = @transform_2, window_bounds = array<i64: 12, 1>}, {pipeline_mode = #tpu.pipeline_mode<synchronous>, transform_indices = @transform_3, window_bounds = array<i64: 12, 4>}, {pipeline_mode = #tpu.pipeline_mode<synchronous>, transform_indices = @transform_4, window_bounds = array<i64: 12, 1>}, {transform_indices = @transform_5, window_bounds = array<i64: 1, 12, 128>}, {transform_indices = @transform_6, window_bounds = array<i64: 1, 12, 128>}]} {
    %c0 = arith.constant 0 : index
    %c0_0 = arith.constant 0 : index
    %c0_1 = arith.constant 0 : index
    %0 = vector.load %arg2[%c0, %c0_0, %c0_1] : memref<1x4x128xbf16, #tpu.memory_space<vmem>>, vector<1x4x128xbf16>
    %1 = vector.shape_cast %0 : vector<1x4x128xbf16> to vector<4x128xbf16>
    %c0_2 = arith.constant 0 : index
    %c0_3 = arith.constant 0 : index
    %2 = vector.load %arg3[%c0_2, %c0_3] : memref<12x4xbf16, #tpu.memory_space<vmem>>, vector<12x4xbf16>
    %cst = arith.constant dense<0.000000e+00> : vector<12x128xf32>
    %3 = tpu.matmul %2, %1, %cst {dimension_numbers = #tpu.dot_dimension_numbers<[1], [0], [0], [1], [0, 0, 1, 1], [], []>} : vector<12x4xbf16>, vector<4x128xbf16>, vector<12x128xf32> -> vector<12x128xf32>
    %c0_4 = arith.constant 0 : index
    %c0_5 = arith.constant 0 : index
    %4 = vector.load %arg4[%c0_4, %c0_5] : memref<12x1xf32, #tpu.memory_space<vmem>>, vector<12x1xf32>
    %5 = vector.broadcast %4 : vector<12x1xf32> to vector<12x128xf32>
    %6 = arith.addf %3, %5 : vector<12x128xf32>
    %c0_6 = arith.constant 0 : index
    %c0_7 = arith.constant 0 : index
    %7 = vector.load %arg5[%c0_6, %c0_7] : memref<12x4xbf16, #tpu.memory_space<vmem>>, vector<12x4xbf16>
    %cst_8 = arith.constant dense<0.000000e+00> : vector<12x128xf32>
    %8 = tpu.matmul %7, %1, %cst_8 {dimension_numbers = #tpu.dot_dimension_numbers<[1], [0], [0], [1], [0, 0, 1, 1], [], []>} : vector<12x4xbf16>, vector<4x128xbf16>, vector<12x128xf32> -> vector<12x128xf32>
    %c0_9 = arith.constant 0 : index
    %c0_10 = arith.constant 0 : index
    %9 = vector.load %arg6[%c0_9, %c0_10] : memref<12x1xf32, #tpu.memory_space<vmem>>, vector<12x1xf32>
    %10 = vector.broadcast %9 : vector<12x1xf32> to vector<12x128xf32>
    %11 = arith.addf %8, %10 : vector<12x128xf32>
    %12 = arith.truncf %6 : vector<12x128xf32> to vector<12x128xbf16>
    %c0_11 = arith.constant 0 : index
    %c0_12 = arith.constant 0 : index
    %c0_13 = arith.constant 0 : index
    %13 = vector.load %arg7[%c0_11, %c0_12, %c0_13] : memref<1x12x128xbf16, #tpu.memory_space<vmem>>, vector<1x12x128xbf16>
    %14 = vector.shape_cast %13 : vector<1x12x128xbf16> to vector<12x128xbf16>
    %15 = vector.shape_cast %12 : vector<12x128xbf16> to vector<1x12x128xbf16>
    tpu.vector_store %arg7[%c0_11, %c0_12, %c0_13], %15 {strides = array<i32>} : memref<1x12x128xbf16, #tpu.memory_space<vmem>>, vector<1x12x128xbf16>,
    %16 = arith.truncf %11 : vector<12x128xf32> to vector<12x128xbf16>
    %c0_14 = arith.constant 0 : index
    %c0_15 = arith.constant 0 : index
    %c0_16 = arith.constant 0 : index
    %17 = vector.load %arg8[%c0_14, %c0_15, %c0_16] : memref<1x12x128xbf16, #tpu.memory_space<vmem>>, vector<1x12x128xbf16>
    %18 = vector.shape_cast %17 : vector<1x12x128xbf16> to vector<12x128xbf16>
    %19 = vector.shape_cast %16 : vector<12x128xbf16> to vector<1x12x128xbf16>
    tpu.vector_store %arg8[%c0_14, %c0_15, %c0_16], %19 {strides = array<i32>} : memref<1x12x128xbf16, #tpu.memory_space<vmem>>, vector<1x12x128xbf16>,
    return
  }
  func.func @transform_0(%arg0: i32, %arg1: i32) -> (i32, i32, i32) {
    %c0_i32 = arith.constant 0 : i32
    %c0_i32_0 = arith.constant 0 : i32
    return %arg0, %c0_i32, %arg1 : i32, i32, i32
  }
  func.func @transform_1(%arg0: i32, %arg1: i32) -> (i32, i32) {
    %c0_i32 = arith.constant 0 : i32
    %c0_i32_0 = arith.constant 0 : i32
    %c0_i32_1 = arith.constant 0 : i32
    return %c0_i32, %c0_i32_0 : i32, i32
  }
  func.func @transform_2(%arg0: i32, %arg1: i32) -> (i32, i32) {
    %c0_i32 = arith.constant 0 : i32
    %c0_i32_0 = arith.constant 0 : i32
    %c0_i32_1 = arith.constant 0 : i32
    return %c0_i32, %c0_i32_0 : i32, i32
  }
  func.func @transform_3(%arg0: i32, %arg1: i32) -> (i32, i32) {
    %c0_i32 = arith.constant 0 : i32
    %c0_i32_0 = arith.constant 0 : i32
    %c0_i32_1 = arith.constant 0 : i32
    return %c0_i32, %c0_i32_0 : i32, i32
  }
  func.func @transform_4(%arg0: i32, %arg1: i32) -> (i32, i32) {
    %c0_i32 = arith.constant 0 : i32
    %c0_i32_0 = arith.constant 0 : i32
    %c0_i32_1 = arith.constant 0 : i32
    return %c0_i32, %c0_i32_0 : i32, i32
  }
  func.func @transform_5(%arg0: i32, %arg1: i32) -> (i32, i32, i32) {
    %c0_i32 = arith.constant 0 : i32
    %c0_i32_0 = arith.constant 0 : i32
    return %arg0, %c0_i32, %arg1 : i32, i32, i32
  }
  func.func @transform_6(%arg0: i32, %arg1: i32) -> (i32, i32, i32) {
    %c0_i32 = arith.constant 0 : i32
    %c0_i32_0 = arith.constant 0 : i32
    return %arg0, %c0_i32, %arg1 : i32, i32, i32
  }
}

module attributes {stable_mosaic.version = 11 : i64} {
  func.func @_attn_agg_kernel(%arg0: i32, %arg1: memref<1x192x8xbf16, #tpu.memory_space<vmem>>, %arg2: memref<1x192x8xbf16, #tpu.memory_space<vmem>>, %arg3: memref<1x64x8xbf16, #tpu.memory_space<vmem>>, %arg4: memref<3x8x8xf32, #tpu.memory_space<vmem>>, %arg5: memref<1x3x1xf32, #tpu.memory_space<vmem>>, %arg6: memref<1x192x8xbf16, #tpu.memory_space<vmem>>) attributes {dimension_semantics = [#tpu.dimension_semantics<parallel>], iteration_bounds = array<i64: 2>, scalar_prefetch = 0 : i64, scratch_operands = 0 : i64, tpu.core_type = #tpu.core_type<tc>, window_params = [{transform_indices = @transform_0, window_bounds = array<i64: 1, 192, 8>}, {transform_indices = @transform_1, window_bounds = array<i64: 1, 192, 8>}, {transform_indices = @transform_2, window_bounds = array<i64: 1, 64, 8>}, {pipeline_mode = #tpu.pipeline_mode<synchronous>, transform_indices = @transform_3, window_bounds = array<i64: 3, 8, 8>}, {transform_indices = @transform_4, window_bounds = array<i64: 1, 3, 1>}, {transform_indices = @transform_5, window_bounds = array<i64: 1, 192, 8>}]} {
    %c0 = arith.constant 0 : index
    %c0_0 = arith.constant 0 : index
    %c0_1 = arith.constant 0 : index
    %0 = vector.load %arg3[%c0, %c0_0, %c0_1] : memref<1x64x8xbf16, #tpu.memory_space<vmem>>, vector<1x64x8xbf16>
    %1 = vector.shape_cast %0 : vector<1x64x8xbf16> to vector<64x8xbf16>
    %c0_2 = arith.constant 0 : index
    %c0_3 = arith.constant 0 : index
    %c0_4 = arith.constant 0 : index
    %2 = vector.load %arg1[%c0_2, %c0_3, %c0_4] : memref<1x192x8xbf16, #tpu.memory_space<vmem>>, vector<1x64x8xbf16>
    %3 = vector.shape_cast %2 : vector<1x64x8xbf16> to vector<64x8xbf16>
    %c0_5 = arith.constant 0 : index
    %c0_6 = arith.constant 0 : index
    %c0_7 = arith.constant 0 : index
    %4 = vector.load %arg2[%c0_5, %c0_6, %c0_7] : memref<1x192x8xbf16, #tpu.memory_space<vmem>>, vector<1x64x8xbf16>
    %5 = vector.shape_cast %4 : vector<1x64x8xbf16> to vector<64x8xbf16>
    %cst = arith.constant dense<0.000000e+00> : vector<8x8xf32>
    %6 = tpu.matmul %3, %5, %cst {dimension_numbers = #tpu.dot_dimension_numbers<[0], [0], [1], [1], [0, 1, 1, 1], [], []>} : vector<64x8xbf16>, vector<64x8xbf16>, vector<8x8xf32> -> vector<8x8xf32>
    %cst_8 = arith.constant 1.562500e-02 : f32
    %7 = vector.broadcast %cst_8 : f32 to vector<8x8xf32>
    %8 = arith.mulf %6, %7 : vector<8x8xf32>
    %cst_9 = arith.constant dense<0xFF800000> : vector<8xf32>
    %9 = vector.multi_reduction <maximumf>, %8, %cst_9 [0] : vector<8x8xf32> to vector<8xf32>
    %10 = vector.shape_cast %9 : vector<8xf32> to vector<1x8xf32>
    %11 = vector.broadcast %10 : vector<1x8xf32> to vector<8x8xf32>
    %12 = arith.subf %8, %11 : vector<8x8xf32>
    %13 = math.exp %12 : vector<8x8xf32>
    %cst_10 = arith.constant dense<0.000000e+00> : vector<8xf32>
    %14 = vector.multi_reduction <add>, %13, %cst_10 [0] : vector<8x8xf32> to vector<8xf32>
    %15 = vector.shape_cast %14 : vector<8xf32> to vector<1x8xf32>
    %16 = tpu.reciprocal %15 {approx = true} : vector<1x8xf32> -> vector<1x8xf32>
    %17 = vector.broadcast %16 : vector<1x8xf32> to vector<8x8xf32>
    %18 = arith.mulf %13, %17 : vector<8x8xf32>
    %c0_11 = arith.constant 0 : index
    %c0_12 = arith.constant 0 : index
    %c0_13 = arith.constant 0 : index
    %19 = vector.load %arg5[%c0_11, %c0_12, %c0_13] : memref<1x3x1xf32, #tpu.memory_space<vmem>>, vector<1x1x1xf32>
    %20 = vector.shape_cast %19 : vector<1x1x1xf32> to vector<1x1xf32>
    %21 = vector.broadcast %20 : vector<1x1xf32> to vector<8x8xf32>
    %22 = arith.mulf %21, %18 : vector<8x8xf32>
    %c0_14 = arith.constant 0 : index
    %c0_15 = arith.constant 0 : index
    %c0_16 = arith.constant 0 : index
    %23 = vector.load %arg4[%c0_14, %c0_15, %c0_16] : memref<3x8x8xf32, #tpu.memory_space<vmem>>, vector<1x8x8xf32>
    %24 = vector.shape_cast %23 : vector<1x8x8xf32> to vector<8x8xf32>
    %25 = arith.addf %22, %24 : vector<8x8xf32>
    %26 = arith.truncf %25 : vector<8x8xf32> to vector<8x8xbf16>
    %cst_17 = arith.constant dense<0.000000e+00> : vector<64x8xf32>
    %27 = tpu.matmul %1, %26, %cst_17 {dimension_numbers = #tpu.dot_dimension_numbers<[1], [0], [0], [1], [0, 0, 1, 1], [], []>} : vector<64x8xbf16>, vector<8x8xbf16>, vector<64x8xf32> -> vector<64x8xf32>
    %28 = arith.truncf %27 : vector<64x8xf32> to vector<64x8xbf16>
    %c0_18 = arith.constant 0 : index
    %c0_19 = arith.constant 0 : index
    %c0_20 = arith.constant 0 : index
    %29 = vector.load %arg6[%c0_18, %c0_19, %c0_20] : memref<1x192x8xbf16, #tpu.memory_space<vmem>>, vector<1x64x8xbf16>
    %30 = vector.shape_cast %29 : vector<1x64x8xbf16> to vector<64x8xbf16>
    %31 = vector.shape_cast %28 : vector<64x8xbf16> to vector<1x64x8xbf16>
    tpu.vector_store %arg6[%c0_18, %c0_19, %c0_20], %31 {strides = array<i32>} : memref<1x192x8xbf16, #tpu.memory_space<vmem>>, vector<1x64x8xbf16>,
    %c0_21 = arith.constant 0 : index
    %c64 = arith.constant 64 : index
    %c0_22 = arith.constant 0 : index
    %32 = vector.load %arg1[%c0_21, %c64, %c0_22] : memref<1x192x8xbf16, #tpu.memory_space<vmem>>, vector<1x64x8xbf16>
    %33 = vector.shape_cast %32 : vector<1x64x8xbf16> to vector<64x8xbf16>
    %c0_23 = arith.constant 0 : index
    %c64_24 = arith.constant 64 : index
    %c0_25 = arith.constant 0 : index
    %34 = vector.load %arg2[%c0_23, %c64_24, %c0_25] : memref<1x192x8xbf16, #tpu.memory_space<vmem>>, vector<1x64x8xbf16>
    %35 = vector.shape_cast %34 : vector<1x64x8xbf16> to vector<64x8xbf16>
    %cst_26 = arith.constant dense<0.000000e+00> : vector<8x8xf32>
    %36 = tpu.matmul %33, %35, %cst_26 {dimension_numbers = #tpu.dot_dimension_numbers<[0], [0], [1], [1], [0, 1, 1, 1], [], []>} : vector<64x8xbf16>, vector<64x8xbf16>, vector<8x8xf32> -> vector<8x8xf32>
    %cst_27 = arith.constant 1.562500e-02 : f32
    %37 = vector.broadcast %cst_27 : f32 to vector<8x8xf32>
    %38 = arith.mulf %36, %37 : vector<8x8xf32>
    %cst_28 = arith.constant dense<0xFF800000> : vector<8xf32>
    %39 = vector.multi_reduction <maximumf>, %38, %cst_28 [0] : vector<8x8xf32> to vector<8xf32>
    %40 = vector.shape_cast %39 : vector<8xf32> to vector<1x8xf32>
    %41 = vector.broadcast %40 : vector<1x8xf32> to vector<8x8xf32>
    %42 = arith.subf %38, %41 : vector<8x8xf32>
    %43 = math.exp %42 : vector<8x8xf32>
    %cst_29 = arith.constant dense<0.000000e+00> : vector<8xf32>
    %44 = vector.multi_reduction <add>, %43, %cst_29 [0] : vector<8x8xf32> to vector<8xf32>
    %45 = vector.shape_cast %44 : vector<8xf32> to vector<1x8xf32>
    %46 = tpu.reciprocal %45 {approx = true} : vector<1x8xf32> -> vector<1x8xf32>
    %47 = vector.broadcast %46 : vector<1x8xf32> to vector<8x8xf32>
    %48 = arith.mulf %43, %47 : vector<8x8xf32>
    %c0_30 = arith.constant 0 : index
    %c1 = arith.constant 1 : index
    %c0_31 = arith.constant 0 : index
    %49 = vector.load %arg5[%c0_30, %c1, %c0_31] : memref<1x3x1xf32, #tpu.memory_space<vmem>>, vector<1x1x1xf32>
    %50 = vector.shape_cast %49 : vector<1x1x1xf32> to vector<1x1xf32>
    %51 = vector.broadcast %50 : vector<1x1xf32> to vector<8x8xf32>
    %52 = arith.mulf %51, %48 : vector<8x8xf32>
    %c1_32 = arith.constant 1 : index
    %c0_33 = arith.constant 0 : index
    %c0_34 = arith.constant 0 : index
    %53 = vector.load %arg4[%c1_32, %c0_33, %c0_34] : memref<3x8x8xf32, #tpu.memory_space<vmem>>, vector<1x8x8xf32>
    %54 = vector.shape_cast %53 : vector<1x8x8xf32> to vector<8x8xf32>
    %55 = arith.addf %52, %54 : vector<8x8xf32>
    %56 = arith.truncf %55 : vector<8x8xf32> to vector<8x8xbf16>
    %cst_35 = arith.constant dense<0.000000e+00> : vector<64x8xf32>
    %57 = tpu.matmul %1, %56, %cst_35 {dimension_numbers = #tpu.dot_dimension_numbers<[1], [0], [0], [1], [0, 0, 1, 1], [], []>} : vector<64x8xbf16>, vector<8x8xbf16>, vector<64x8xf32> -> vector<64x8xf32>
    %58 = arith.truncf %57 : vector<64x8xf32> to vector<64x8xbf16>
    %c0_36 = arith.constant 0 : index
    %c64_37 = arith.constant 64 : index
    %c0_38 = arith.constant 0 : index
    %59 = vector.load %arg6[%c0_36, %c64_37, %c0_38] : memref<1x192x8xbf16, #tpu.memory_space<vmem>>, vector<1x64x8xbf16>
    %60 = vector.shape_cast %59 : vector<1x64x8xbf16> to vector<64x8xbf16>
    %61 = vector.shape_cast %58 : vector<64x8xbf16> to vector<1x64x8xbf16>
    tpu.vector_store %arg6[%c0_36, %c64_37, %c0_38], %61 {strides = array<i32>} : memref<1x192x8xbf16, #tpu.memory_space<vmem>>, vector<1x64x8xbf16>,
    %c0_39 = arith.constant 0 : index
    %c128 = arith.constant 128 : index
    %c0_40 = arith.constant 0 : index
    %62 = vector.load %arg1[%c0_39, %c128, %c0_40] : memref<1x192x8xbf16, #tpu.memory_space<vmem>>, vector<1x64x8xbf16>
    %63 = vector.shape_cast %62 : vector<1x64x8xbf16> to vector<64x8xbf16>
    %c0_41 = arith.constant 0 : index
    %c128_42 = arith.constant 128 : index
    %c0_43 = arith.constant 0 : index
    %64 = vector.load %arg2[%c0_41, %c128_42, %c0_43] : memref<1x192x8xbf16, #tpu.memory_space<vmem>>, vector<1x64x8xbf16>
    %65 = vector.shape_cast %64 : vector<1x64x8xbf16> to vector<64x8xbf16>
    %cst_44 = arith.constant dense<0.000000e+00> : vector<8x8xf32>
    %66 = tpu.matmul %63, %65, %cst_44 {dimension_numbers = #tpu.dot_dimension_numbers<[0], [0], [1], [1], [0, 1, 1, 1], [], []>} : vector<64x8xbf16>, vector<64x8xbf16>, vector<8x8xf32> -> vector<8x8xf32>
    %cst_45 = arith.constant 1.562500e-02 : f32
    %67 = vector.broadcast %cst_45 : f32 to vector<8x8xf32>
    %68 = arith.mulf %66, %67 : vector<8x8xf32>
    %cst_46 = arith.constant dense<0xFF800000> : vector<8xf32>
    %69 = vector.multi_reduction <maximumf>, %68, %cst_46 [0] : vector<8x8xf32> to vector<8xf32>
    %70 = vector.shape_cast %69 : vector<8xf32> to vector<1x8xf32>
    %71 = vector.broadcast %70 : vector<1x8xf32> to vector<8x8xf32>
    %72 = arith.subf %68, %71 : vector<8x8xf32>
    %73 = math.exp %72 : vector<8x8xf32>
    %cst_47 = arith.constant dense<0.000000e+00> : vector<8xf32>
    %74 = vector.multi_reduction <add>, %73, %cst_47 [0] : vector<8x8xf32> to vector<8xf32>
    %75 = vector.shape_cast %74 : vector<8xf32> to vector<1x8xf32>
    %76 = tpu.reciprocal %75 {approx = true} : vector<1x8xf32> -> vector<1x8xf32>
    %77 = vector.broadcast %76 : vector<1x8xf32> to vector<8x8xf32>
    %78 = arith.mulf %73, %77 : vector<8x8xf32>
    %c0_48 = arith.constant 0 : index
    %c2 = arith.constant 2 : index
    %c0_49 = arith.constant 0 : index
    %79 = vector.load %arg5[%c0_48, %c2, %c0_49] : memref<1x3x1xf32, #tpu.memory_space<vmem>>, vector<1x1x1xf32>
    %80 = vector.shape_cast %79 : vector<1x1x1xf32> to vector<1x1xf32>
    %81 = vector.broadcast %80 : vector<1x1xf32> to vector<8x8xf32>
    %82 = arith.mulf %81, %78 : vector<8x8xf32>
    %c2_50 = arith.constant 2 : index
    %c0_51 = arith.constant 0 : index
    %c0_52 = arith.constant 0 : index
    %83 = vector.load %arg4[%c2_50, %c0_51, %c0_52] : memref<3x8x8xf32, #tpu.memory_space<vmem>>, vector<1x8x8xf32>
    %84 = vector.shape_cast %83 : vector<1x8x8xf32> to vector<8x8xf32>
    %85 = arith.addf %82, %84 : vector<8x8xf32>
    %86 = arith.truncf %85 : vector<8x8xf32> to vector<8x8xbf16>
    %cst_53 = arith.constant dense<0.000000e+00> : vector<64x8xf32>
    %87 = tpu.matmul %1, %86, %cst_53 {dimension_numbers = #tpu.dot_dimension_numbers<[1], [0], [0], [1], [0, 0, 1, 1], [], []>} : vector<64x8xbf16>, vector<8x8xbf16>, vector<64x8xf32> -> vector<64x8xf32>
    %88 = arith.truncf %87 : vector<64x8xf32> to vector<64x8xbf16>
    %c0_54 = arith.constant 0 : index
    %c128_55 = arith.constant 128 : index
    %c0_56 = arith.constant 0 : index
    %89 = vector.load %arg6[%c0_54, %c128_55, %c0_56] : memref<1x192x8xbf16, #tpu.memory_space<vmem>>, vector<1x64x8xbf16>
    %90 = vector.shape_cast %89 : vector<1x64x8xbf16> to vector<64x8xbf16>
    %91 = vector.shape_cast %88 : vector<64x8xbf16> to vector<1x64x8xbf16>
    tpu.vector_store %arg6[%c0_54, %c128_55, %c0_56], %91 {strides = array<i32>} : memref<1x192x8xbf16, #tpu.memory_space<vmem>>, vector<1x64x8xbf16>,
    return
  }
  func.func @transform_0(%arg0: i32) -> (i32, i32, i32) {
    %c0_i32 = arith.constant 0 : i32
    %c0_i32_0 = arith.constant 0 : i32
    %c0_i32_1 = arith.constant 0 : i32
    return %arg0, %c0_i32, %c0_i32_0 : i32, i32, i32
  }
  func.func @transform_1(%arg0: i32) -> (i32, i32, i32) {
    %c0_i32 = arith.constant 0 : i32
    %c0_i32_0 = arith.constant 0 : i32
    %c0_i32_1 = arith.constant 0 : i32
    return %arg0, %c0_i32, %c0_i32_0 : i32, i32, i32
  }
  func.func @transform_2(%arg0: i32) -> (i32, i32, i32) {
    %c0_i32 = arith.constant 0 : i32
    %c0_i32_0 = arith.constant 0 : i32
    %c0_i32_1 = arith.constant 0 : i32
    return %arg0, %c0_i32, %c0_i32_0 : i32, i32, i32
  }
  func.func @transform_3(%arg0: i32) -> (i32, i32, i32) {
    %c0_i32 = arith.constant 0 : i32
    %c0_i32_0 = arith.constant 0 : i32
    %c0_i32_1 = arith.constant 0 : i32
    %c0_i32_2 = arith.constant 0 : i32
    return %c0_i32, %c0_i32_0, %c0_i32_1 : i32, i32, i32
  }
  func.func @transform_4(%arg0: i32) -> (i32, i32, i32) {
    %c0_i32 = arith.constant 0 : i32
    %c0_i32_0 = arith.constant 0 : i32
    %c0_i32_1 = arith.constant 0 : i32
    return %arg0, %c0_i32, %c0_i32_0 : i32, i32, i32
  }
  func.func @transform_5(%arg0: i32) -> (i32, i32, i32) {
    %c0_i32 = arith.constant 0 : i32
    %c0_i32_0 = arith.constant 0 : i32
    %c0_i32_1 = arith.constant 0 : i32
    return %arg0, %c0_i32, %c0_i32_0 : i32, i32, i32
  }
}

module attributes {stable_mosaic.version = 11 : i64} {
  func.func @_finalize_kernel(%arg0: i32, %arg1: i32, %arg2: memref<1x12x128xbf16, #tpu.memory_space<vmem>>, %arg3: memref<1x4x128xf32, #tpu.memory_space<vmem>>, %arg4: memref<16x12xbf16, #tpu.memory_space<vmem>>, %arg5: memref<1x16x2xf32, #tpu.memory_space<vmem>>, %arg6: memref<16x4xbf16, #tpu.memory_space<vmem>>, %arg7: memref<16x1xf32, #tpu.memory_space<vmem>>, %arg8: memref<16x1xf32, #tpu.memory_space<vmem>>, %arg9: memref<1x16x128xf32, #tpu.memory_space<vmem>>) attributes {dimension_semantics = [#tpu.dimension_semantics<parallel>, #tpu.dimension_semantics<parallel>], iteration_bounds = array<i64: 2, 1>, scalar_prefetch = 0 : i64, scratch_operands = 0 : i64, tpu.core_type = #tpu.core_type<tc>, window_params = [{transform_indices = @transform_0, window_bounds = array<i64: 1, 12, 128>}, {transform_indices = @transform_1, window_bounds = array<i64: 1, 4, 128>}, {pipeline_mode = #tpu.pipeline_mode<synchronous>, transform_indices = @transform_2, window_bounds = array<i64: 16, 12>}, {transform_indices = @transform_3, window_bounds = array<i64: 1, 16, 2>}, {pipeline_mode = #tpu.pipeline_mode<synchronous>, transform_indices = @transform_4, window_bounds = array<i64: 16, 4>}, {pipeline_mode = #tpu.pipeline_mode<synchronous>, transform_indices = @transform_5, window_bounds = array<i64: 16, 1>}, {pipeline_mode = #tpu.pipeline_mode<synchronous>, transform_indices = @transform_6, window_bounds = array<i64: 16, 1>}, {transform_indices = @transform_7, window_bounds = array<i64: 1, 16, 128>}]} {
    %c0 = arith.constant 0 : index
    %c0_0 = arith.constant 0 : index
    %0 = vector.load %arg4[%c0, %c0_0] : memref<16x12xbf16, #tpu.memory_space<vmem>>, vector<16x12xbf16>
    %c0_1 = arith.constant 0 : index
    %c0_2 = arith.constant 0 : index
    %c0_3 = arith.constant 0 : index
    %1 = vector.load %arg2[%c0_1, %c0_2, %c0_3] : memref<1x12x128xbf16, #tpu.memory_space<vmem>>, vector<1x12x128xbf16>
    %2 = vector.shape_cast %1 : vector<1x12x128xbf16> to vector<12x128xbf16>
    %cst = arith.constant dense<0.000000e+00> : vector<16x128xf32>
    %3 = tpu.matmul %0, %2, %cst {dimension_numbers = #tpu.dot_dimension_numbers<[1], [0], [0], [1], [0, 0, 1, 1], [], []>} : vector<16x12xbf16>, vector<12x128xbf16>, vector<16x128xf32> -> vector<16x128xf32>
    %c0_4 = arith.constant 0 : index
    %c0_5 = arith.constant 0 : index
    %c0_6 = arith.constant 0 : index
    %4 = vector.load %arg5[%c0_4, %c0_5, %c0_6] : memref<1x16x2xf32, #tpu.memory_space<vmem>>, vector<1x16x1xf32>
    %5 = vector.shape_cast %4 : vector<1x16x1xf32> to vector<16x1xf32>
    %6 = vector.broadcast %5 : vector<16x1xf32> to vector<16x128xf32>
    %7 = arith.mulf %6, %3 : vector<16x128xf32>
    %c0_7 = arith.constant 0 : index
    %c0_8 = arith.constant 0 : index
    %c1 = arith.constant 1 : index
    %8 = vector.load %arg5[%c0_7, %c0_8, %c1] : memref<1x16x2xf32, #tpu.memory_space<vmem>>, vector<1x16x1xf32>
    %9 = vector.shape_cast %8 : vector<1x16x1xf32> to vector<16x1xf32>
    %10 = vector.broadcast %9 : vector<16x1xf32> to vector<16x128xf32>
    %11 = arith.addf %7, %10 : vector<16x128xf32>
    %c0_9 = arith.constant 0 : index
    %c0_10 = arith.constant 0 : index
    %12 = vector.load %arg6[%c0_9, %c0_10] : memref<16x4xbf16, #tpu.memory_space<vmem>>, vector<16x4xbf16>
    %c0_11 = arith.constant 0 : index
    %c0_12 = arith.constant 0 : index
    %c0_13 = arith.constant 0 : index
    %13 = vector.load %arg3[%c0_11, %c0_12, %c0_13] : memref<1x4x128xf32, #tpu.memory_space<vmem>>, vector<1x4x128xf32>
    %14 = vector.shape_cast %13 : vector<1x4x128xf32> to vector<4x128xf32>
    %15 = arith.truncf %14 : vector<4x128xf32> to vector<4x128xbf16>
    %cst_14 = arith.constant dense<0.000000e+00> : vector<16x128xf32>
    %16 = tpu.matmul %12, %15, %cst_14 {dimension_numbers = #tpu.dot_dimension_numbers<[1], [0], [0], [1], [0, 0, 1, 1], [], []>} : vector<16x4xbf16>, vector<4x128xbf16>, vector<16x128xf32> -> vector<16x128xf32>
    %c0_15 = arith.constant 0 : index
    %c0_16 = arith.constant 0 : index
    %17 = vector.load %arg7[%c0_15, %c0_16] : memref<16x1xf32, #tpu.memory_space<vmem>>, vector<16x1xf32>
    %18 = vector.broadcast %17 : vector<16x1xf32> to vector<16x128xf32>
    %19 = arith.mulf %18, %16 : vector<16x128xf32>
    %c0_17 = arith.constant 0 : index
    %c0_18 = arith.constant 0 : index
    %20 = vector.load %arg8[%c0_17, %c0_18] : memref<16x1xf32, #tpu.memory_space<vmem>>, vector<16x1xf32>
    %21 = vector.broadcast %20 : vector<16x1xf32> to vector<16x128xf32>
    %22 = arith.addf %19, %21 : vector<16x128xf32>
    %23 = arith.addf %11, %22 : vector<16x128xf32>
    %cst_19 = arith.constant 0.000000e+00 : f32
    %24 = vector.broadcast %cst_19 : f32 to vector<16x128xf32>
    %25 = arith.maximumf %23, %24 : vector<16x128xf32>
    %c0_20 = arith.constant 0 : index
    %c0_21 = arith.constant 0 : index
    %c0_22 = arith.constant 0 : index
    %26 = vector.load %arg9[%c0_20, %c0_21, %c0_22] : memref<1x16x128xf32, #tpu.memory_space<vmem>>, vector<1x16x128xf32>
    %27 = vector.shape_cast %26 : vector<1x16x128xf32> to vector<16x128xf32>
    %28 = vector.shape_cast %25 : vector<16x128xf32> to vector<1x16x128xf32>
    tpu.vector_store %arg9[%c0_20, %c0_21, %c0_22], %28 {strides = array<i32>} : memref<1x16x128xf32, #tpu.memory_space<vmem>>, vector<1x16x128xf32>,
    return
  }
  func.func @transform_0(%arg0: i32, %arg1: i32) -> (i32, i32, i32) {
    %c0_i32 = arith.constant 0 : i32
    %c0_i32_0 = arith.constant 0 : i32
    return %arg0, %c0_i32, %arg1 : i32, i32, i32
  }
  func.func @transform_1(%arg0: i32, %arg1: i32) -> (i32, i32, i32) {
    %c0_i32 = arith.constant 0 : i32
    %c0_i32_0 = arith.constant 0 : i32
    return %arg0, %c0_i32, %arg1 : i32, i32, i32
  }
  func.func @transform_2(%arg0: i32, %arg1: i32) -> (i32, i32) {
    %c0_i32 = arith.constant 0 : i32
    %c0_i32_0 = arith.constant 0 : i32
    %c0_i32_1 = arith.constant 0 : i32
    return %c0_i32, %c0_i32_0 : i32, i32
  }
  func.func @transform_3(%arg0: i32, %arg1: i32) -> (i32, i32, i32) {
    %c0_i32 = arith.constant 0 : i32
    %c0_i32_0 = arith.constant 0 : i32
    %c0_i32_1 = arith.constant 0 : i32
    return %arg0, %c0_i32, %c0_i32_0 : i32, i32, i32
  }
  func.func @transform_4(%arg0: i32, %arg1: i32) -> (i32, i32) {
    %c0_i32 = arith.constant 0 : i32
    %c0_i32_0 = arith.constant 0 : i32
    %c0_i32_1 = arith.constant 0 : i32
    return %c0_i32, %c0_i32_0 : i32, i32
  }
  func.func @transform_5(%arg0: i32, %arg1: i32) -> (i32, i32) {
    %c0_i32 = arith.constant 0 : i32
    %c0_i32_0 = arith.constant 0 : i32
    %c0_i32_1 = arith.constant 0 : i32
    return %c0_i32, %c0_i32_0 : i32, i32
  }
  func.func @transform_6(%arg0: i32, %arg1: i32) -> (i32, i32) {
    %c0_i32 = arith.constant 0 : i32
    %c0_i32_0 = arith.constant 0 : i32
    %c0_i32_1 = arith.constant 0 : i32
    return %c0_i32, %c0_i32_0 : i32, i32
  }
  func.func @transform_7(%arg0: i32, %arg1: i32) -> (i32, i32, i32) {
    %c0_i32 = arith.constant 0 : i32
    %c0_i32_0 = arith.constant 0 : i32
    return %arg0, %c0_i32, %arg1 : i32, i32, i32
  }
}

</mosaic_0001>

<bundles_post_ra>
// kernel: unit_gcn_forward.3
= control target key start
LH: loop header
LB: loop body
LE: loop exit
PB: predicated region body
PF: predicated region fallthrough
CT: control target
= control target key end

     0   :  { %s716_s21 = smov 0   ;;  %s718_s22 = smov 0   ;;  %s774_s0 = inlined_call_operand.vmem [shape: bf16[2,4,128], index: 0, kind: input, shape index: {}]   ;;  %s775_s1 = inlined_call_operand.vmem [shape: bf16[12,4], index: 1, kind: input, shape index: {}]   ;;  %s776_s2 = inlined_call_operand.vmem [shape: f32[12,1], index: 2, kind: input, shape index: {}]   ;;  %s777_s3 = inlined_call_operand.vmem [shape: bf16[12,4], index: 3, kind: input, shape index: {}]   ;;  %s778_s4 = inlined_call_operand.vmem [shape: f32[12,1], index: 4, kind: input, shape index: {}]   ;;  %s779_s5 = inlined_call_operand.vmem [shape: bf16[2,12,128], index: 5, kind: output, shape index: {0}]   ;;  %s780_s6 = inlined_call_operand.vmem [shape: bf16[2,12,128], index: 6, kind: output, shape index: {1}]  }
   0x1   :  { %s720_s23 = smov 0  }
   0x2 LB: > { %s29_s24 = sadd.s32 1, %s672_s22  ;;  %p585_p0 = scmp.ge.s32.totalorder %s676_s23, 1  ;;  %s676_s23 = sphi %s720_s23, %s17_s23   ;;  %s672_s22 = sphi %s718_s22, %s782_s22   ;;  %s668_s21 = sphi %s716_s21, %s781_s21  }
   0x3   : > { %p31_p1 = scmp.ge.s32.totalorder %s29_s24, 2  ;;  %p235_p2 = scmp.lt.s32.totalorder %s676_s23, 3 }
   0x5   : > { %s784_s24 = smov (%p31_p1, %s29_s24), 0  ;;  %p236_p3 = pnand %p585_p0, %p235_p2 }
   0x6   : > { %p278_p4 = scmp.lt.s32.totalorder (!%p236_p3), %s668_s21, 1  ;;  %v678_v0 = vmov (!%p236_p3), 0.0   ;;  %vm679_vm0 = vmmov (!%p236_p3), 0   ;;  %v373_v1 = vld [vmem:[%s778_s4] sm:$0xff] (!%p236_p3)  ;;  %v680_v2 = vmov (!%p236_p3), 0   ;;  %vm326_vm1 = vcmask (!%p236_p3), 1041408  }
   0x7   : > { %239 = sbr.rel (%p236_p3) target bundleno = 241 (0xf1), region = 40  ;;  %611 = vmatprep.subr.bf16.mxu0 (!%p236_p3), %v678_v0  ;;  %617 = vmatprep.subr.bf16.mxu1 (!%p236_p3), %v678_v0  ;;  %v305_v3 = vld [vmem:[%s776_s2] sm:$0xff] (!%p236_p3)  ;;  %v374_v5 = vld [vmem:[%s778_s4 + $0x8] sm:$0xf] (!%p236_p3)  ;;  %vm322_vm2 = vcmask (!%p236_p3), 31744  }
   0x8   : > { %613 = vmatprep.mubr.msk.bf16.mxu0 (!%p236_p3), %vm679_vm0, %v678_v0  ;;  %619 = vmatprep.mubr.msk.bf16.mxu1 (!%p236_p3), %vm679_vm0, %v678_v0  ;;  %v306_v6 = vld [vmem:[%s776_s2 + $0x8] sm:$0xf] (!%p236_p3)  ;;  %v652_v8 = vld [vmem:[%s775_s1] sm:$0x3f] (!%p236_p3)  }
   0x9   : > { %651 = vset.pattern.permute.xlu1 (!%p236_p3), %v680_v2  ;;  %650 = vset.pattern.permute.xlu0 (!%p236_p3), %v680_v2  ;;  %v653_v9 = vld [vmem:[%s777_s3] sm:$0x3f] (!%p236_p3)  }
   0xa   : > { %377 = vperm.xlu1 (!%p236_p3), %651, %v373_v1   ;;  %309 = vperm.xlu0 (!%p236_p3), %650, %v305_v3  }
   0xe   : > { %s786_s21 = smov (!%p278_p4, %s668_s21), 1  ;;  %382 = vperm.xlu1 %651, %v374_v5   ;;  %314 = vperm.xlu0 %650, %v306_v6  }
   0xf   : > { %s586_s29 = sshll.u32 %s786_s21, 1  ;;  %s601_s17 = sshll.u32 %s786_s21, 3 }
  0x10   : > { %s284_s8 = scalar_lea.vmem %s774_s0, %s586_s29  ;;  %s292_s20 = scalar_lea.vmem %s779_s5, %s601_s17 }
  0x11   : > { %v302_v4 = vld [vmem:[%s284_s8] sm:$0x3]  ;;  %s300_s27 = scalar_lea.vmem %s780_s6, %s601_s17 }
  0x12   : > { %v328_v7 = vsel %vm326_vm1, %v302_v4, 0 }
  0x13   : > { %612 = vmatpush3.bf16.msra.mxu0 %v328_v7  ;;  %618 = vmatpush3.bf16.msra.mxu1 %v328_v7 }
  0x16   : > { %614 = vmatmul.mubr.msk.bf16.vlgmr.msra.gmra.mrb[0].mxu0 %vm322_vm2, %v652_v8  ;;  %620 = vmatmul.mubr.msk.bf16.vlgmr.msra.gmra.mrb[0].mxu1 %vm322_vm2, %v653_v9 }
  0x89   : > { %v378_v10 = vpop.permute.xlu1 %377  ;;  %v310_v11 = vpop.permute.xlu0 %309 }
  0x8d   : > { %v383_v12 = vpop.permute.xlu1 %382  ;;  %v315_v13 = vpop.permute.xlu0 %314 }
  0xe9   : > { %v364_v14 = vpop.f32.mrb[0].mxu0  ;;  %v427_v15 = vpop.f32.mrb[0].mxu1 }
  0xea   : > { %v365_v16 = vadd.f32 %v364_v14, %v310_v11  ;;  %v428_v17 = vadd.f32 %v427_v15, %v378_v10  ;;  %v615_v18 = vpop.f32.mrb[1].mxu0  ;;  %v621_v19 = vpop.f32.mrb[1].mxu1 }
  0xeb   : > { %v367_v20 = vpop.f32.mrb[2].mxu0  ;;  %v430_v21 = vpop.f32.mrb[2].mxu1 }
  0xec   : > { %v603_v22 = vpack.c.bf16 %v365_v16, %v365_v16  ;;  %v605_v23 = vpack.c.bf16 %v428_v17, %v428_v17  ;;  %v368_v24 = vadd.f32 %v367_v20, %v315_v13  ;;  %v431_v25 = vadd.f32 %v430_v21, %v383_v12  ;;  %v616_v26 = vpop.f32.mrb[3].mxu0  ;;  %v622_v27 = vpop.f32.mrb[3].mxu1 }
  0xee   : > { %442 = vst [vmem:[%s292_s20] sm:$0xf] %v603_v22  ;;  %452 = vst [vmem:[%s300_s27] sm:$0xf] %v605_v23  ;;  %v604_v28 = vpack.c.bf16 %v368_v24, %v368_v24  ;;  %v606_v29 = vpack.c.bf16 %v431_v25, %v431_v25 }
  0xf0   : > { %443 = vst [vmem:[%s292_s20 + $0x4] sm:$0x3] %v604_v28  ;;  %453 = vst [vmem:[%s300_s27 + $0x4] sm:$0x3] %v606_v29 }
  0xf1 PF: > { %s17_s23 = sadd.s32 1, %s676_s23   ;;  %s781_s21 = smov %s672_s22 }
  0xf2   : > { %p14_p5 = scmp.ge.s32.totalorder %s17_s23, 4   ;;  %s782_s22 = smov %s784_s24 }
  0xf4   :  { %16 = sbr.rel (!%p14_p5) target bundleno = 2 (0x2), region = 82 }

// kernel: unit_gcn_forward.4
= control target key start
LH: loop header
LB: loop body
LE: loop exit
PB: predicated region body
PF: predicated region fallthrough
CT: control target
= control target key end

     0   :  { %s2459_s0 = inlined_call_operand.hbm [shape: bf16[2,192,8], index: 0, kind: input, shape index: {}]   ;;  %s2460_s1 = inlined_call_operand.hbm [shape: bf16[2,192,8], index: 1, kind: input, shape index: {}]   ;;  %s2461_s2 = inlined_call_operand.hbm [shape: bf16[2,64,8], index: 2, kind: input, shape index: {}]   ;;  %s2462_s3 = inlined_call_operand.hbm [shape: f32[3,8,8], index: 3, kind: input, shape index: {}]   ;;  %s2463_s4 = inlined_call_operand.hbm [shape: f32[2,3,1], index: 4, kind: input, shape index: {}]   ;;  %s2464_s5 = inlined_call_operand.hbm [shape: bf16[2,192,8], index: 5, kind: output, shape index: {}]  }
   0x1   :  { %2479 = sst [smem:[#allocation20_spill]] %s2459_s0 }
   0x2   :  { %2480 = sst [smem:[#allocation21_spill]] %s2460_s1 }
   0x3   :  { %10 = vsyncpa [#allocation3], 0 }
   0x4   :  { %12 = vsyncpa [#allocation3 + $0x1], 0 }
   0x5   :  { %13 = vsyncpa [#allocation6], 0 }
   0x6   :  { %15 = vsyncpa [#allocation6 + $0x1], 0 }
   0x7   :  { %16 = vsyncpa [#allocation9], 0 }
   0x8   :  { %17 = vsyncpa [#allocation4], 0 }
   0x9   :  { %19 = vsyncpa [#allocation4 + $0x1], 0  ;;  %s1970_s18 = smov 0   ;;  %s1972_s19 = smov 0  }
   0xa   :  { %s1974_s20 = smov 0   ;;  %s1976_s21 = smov 0  }
   0xb LB: > { %2481 = sst [smem:[#allocation17_spill]] %s1920_s20  ;;  %s1991_s22 = sadd.s32 1, %s1924_s21   ;;  %s1924_s21 = sphi %s1976_s21, %s2506_s21   ;;  %s1920_s20 = sphi %s1974_s20, %s2508_s20   ;;  %s1916_s19 = sphi %s1972_s19, %s2510_s19   ;;  %s1912_s18 = sphi %s1970_s18, %s2509_s18  }
   0xc   : > { %2482 = sst [smem:[#allocation18_spill]] %s1991_s22  ;;  %s32_s23 = sadd.s32 1, %s1920_s20 }
   0xd   : > { %s29_s24 = ssub.s32 %s1924_s21, %s1991_s22  ;;  %p2465_p0 = scmp.ne.s32.totalorder %s1920_s20, %s1916_s19 }
   0xe   : > { %p30_p1 = scmp.eq.s32.totalorder %s29_s24, 0  ;;  %p40_p2 = scmp.eq.s32.totalorder %s1924_s21, 0 }
   0xf   : > { %p1613_p4 = scmp.lt.s32.totalorder %s1924_s21, 2  ;;  %s207_s26 = sand.u32 1, %s1924_s21  }
  0x10   : > { %s2002_s25 = scalar_select %p30_p1, %s1920_s20, %s32_s23  }
  0x11   : > { %p41_p5 = por %p40_p2, %p2465_p0  ;;  %s2009_s27 = sand.u32 1, %s1920_s20  }
  0x12   : > { %2483 = sst [smem:[#allocation19_spill]] %s2002_s25  ;;  %s1565_s28 = smul.u32 96, %s2009_s27 }
  0x13   : > { %p2012_p6 = pnand %p1613_p4, %p41_p5  ;;  %s1566_s30 = smul.u32 1536, %s1924_s21 }
  0x14   : > { %s2485_s0 = sld [smem:[#allocation20_spill]]  ;;  %s211_s9 = scalar_lea.vmem [#allocation2], %s1565_s28 }
  0x15   : > { %s2484_s29 = scalar_select %p2012_p6, 1, 0 }
  0x16   : > { %s218_s10 = sshll.u32 %s211_s9, 4  ;;  %s2030_s11 = scalar_lea.sflag [#allocation3], %s207_s26  ;;  %s2026_s10 = int_to_ptr.vmem [resolvable:$true] %s218_s10 }
  0x17   : > { %p2036_p8 = pneg %p2012_p6 }
  0x19   : > { %s2486_s13 = scalar_select %p2036_p8, 1, 0 }
  0x1a   : > { %s2022_s8 = scalar_lea.hbm %s2485_s0, %s1566_s30  ;;  %s1703_s16 = scalar_lea.hbm %s2485_s0, 3072 }
  0x1b   : > { %s1698_s12 = scalar_lea.hbm %s2022_s8, 1536  ;;  %p1704_p11 = scmp.lt.u32.totalorder %s2022_s8, %s2485_s0 }
  0x1c   : > { %p1699_p7 = scmp.ne.s32.totalorder %s2022_s8, %s1698_s12  ;;  %p1705_p12 = scmp.lt.u32.totalorder %s1703_s16, %s1698_s12 }
  0x1d   : > { %p1707_p1 = scmp.lt.u32.totalorder %s1698_s12, %s2022_s8 }
  0x1e   : > { %p1701_p9 = pnand %p2036_p8, %p1699_p7  ;;  %p1706_p13 = por %p1705_p12, %p1704_p11 }
  0x20   : > { %p1702_p10 = pneg %p1701_p9  ;;  %p1708_p2 = por %p1707_p1, %p1706_p13 }
  0x22   : > { %p1709_p4 = pnand %p1708_p2, %p1702_p10 }
  0x24   : > { %1712 = shalt.err (!%p1709_p4)
}
  0x25   : > { %s1713_s24 = scalar_lea.vmem %s2026_s10, 1536  ;;  %s1926_s6 = smov [#allocation2]  }
  0x26   : > { %p1714_p5 = scmp.ne.s32.totalorder %s2026_s10, %s1713_s24  ;;  %s1718_s7 = sshll.u32 %s1926_s6, 4  ;;  %s1719_s7 = int_to_ptr.vmem [resolvable:$false] %s1718_s7 }
  0x27   : > { %s1720_s9 = scalar_lea.vmem %s1719_s7, 3072  ;;  %p1721_p3 = scmp.lt.s32.totalorder %s2026_s10, %s1719_s7 }
  0x28   : > { %p1716_p7 = pnand %p1714_p5, %p2036_p8  ;;  %p1722_p0 = scmp.lt.s32.totalorder %s1720_s9, %s1713_s24 }
  0x2a   : > { %p1717_p9 = pneg %p1716_p7  ;;  %p1723_p11 = por %p1722_p0, %p1721_p3 }
  0x2c   : > { %p1724_p12 = pnand %p1723_p11, %p1717_p9 }
  0x2e   : > { %1727 = shalt.err (!%p1724_p12)
}
  0x2f   : > { %s2466_s12 = smov 64   ;;  %s2467_s14 = smov 4  }
  0x30   : > { %1598 = dma.hbm_to_vmem [thread:$0]  (!%p2012_p6), %s2022_s8, 1536, %s2026_s10, %s2030_s11, %s2466_s12, %s2466_s12, %s2467_s14  }
  0x31   : > { %s2487_s1 = sld [smem:[#allocation21_spill]]  ;;  %s232_s23 = scalar_lea.vmem [#allocation5], %s1565_s28 }
  0x32   : > { %s239_s24 = sshll.u32 %s232_s23, 4  ;;  %s2076_s6 = scalar_lea.sflag [#allocation6], %s207_s26  ;;  %s2072_s24 = int_to_ptr.vmem [resolvable:$true] %s239_s24 }
  0x37   : > { %s2068_s17 = scalar_lea.hbm %s2487_s1, %s1566_s30  ;;  %s1733_s10 = scalar_lea.hbm %s2487_s1, 3072 }
  0x38   : > { %s1728_s7 = scalar_lea.hbm %s2068_s17, 1536  ;;  %p1734_p13 = scmp.lt.u32.totalorder %s2068_s17, %s2487_s1 }
  0x39   : > { %p1729_p0 = scmp.ne.s32.totalorder %s2068_s17, %s1728_s7  ;;  %p1735_p1 = scmp.lt.u32.totalorder %s1733_s10, %s1728_s7 }
  0x3a   : > { %p1737_p4 = scmp.lt.u32.totalorder %s1728_s7, %s2068_s17 }
  0x3b   : > { %p1731_p3 = pnand %p1729_p0, %p2036_p8  ;;  %p1736_p2 = por %p1735_p1, %p1734_p13 }
  0x3d   : > { %p1732_p10 = pneg %p1731_p3  ;;  %p1738_p5 = por %p1737_p4, %p1736_p2 }
  0x3f   : > { %p1739_p7 = pnand %p1738_p5, %p1732_p10 }
  0x41   : > { %1742 = shalt.err (!%p1739_p7)
}
  0x42   : > { %s1743_s26 = scalar_lea.vmem %s2072_s24, 1536  ;;  %s1929_s28 = smov [#allocation5]  }
  0x43   : > { %p1744_p9 = scmp.ne.s32.totalorder %s2072_s24, %s1743_s26  ;;  %s1748_s16 = sshll.u32 %s1929_s28, 4  ;;  %s1749_s16 = int_to_ptr.vmem [resolvable:$false] %s1748_s16 }
  0x44   : > { %s1750_s23 = scalar_lea.vmem %s1749_s16, 3072  ;;  %p1751_p0 = scmp.lt.s32.totalorder %s2072_s24, %s1749_s16 }
  0x45   : > { %p1746_p11 = pnand %p1744_p9, %p2036_p8  ;;  %p1752_p3 = scmp.lt.s32.totalorder %s1750_s23, %s1743_s26 }
  0x47   : > { %p1747_p12 = pneg %p1746_p11  ;;  %p1753_p13 = por %p1752_p3, %p1751_p0 }
  0x49   : > { %p1754_p1 = pnand %p1753_p13, %p1747_p12 }
  0x4b   : > { %1757 = shalt.err (!%p1754_p1)
}
  0x4c   : > { %1601 = dma.hbm_to_vmem [thread:$0]  (!%p2012_p6), %s2068_s17, 1536, %s2072_s24, %s2076_s6, %s2466_s12, %s2466_s12, %s2467_s14  }
  0x4d   : > { %s2104_s7 = sadd.s32 4294967295, %s1924_s21   ;;  %s1356_s8 = sadd.s32 4294967294, %s1924_s21  }
  0x4e   : > { %p45_p10 = scmp.ne.s32.totalorder %s1916_s19, %s1912_s18  ;;  %p2471_p2 = scmp.eq.s32.totalorder %s2104_s7, 0 }
  0x4f   : > { %p168_p4 = scmp.eq.s32.totalorder %s2104_s7, 1  ;;  %p174_p5 = scmp.eq.s32.totalorder %s1356_s8, 1 }
  0x50   : > { %p1357_p7 = scmp.ge.s32.totalorder %s1924_s21, 1  ;;  %p2114_p9 = por %p2471_p2, %p45_p10 }
  0x51   : > { %p2489_p11 = scmp.ne.s32.totalorder %s1920_s20, %s1916_s19  ;;  %p2125_p0 = por %p174_p5, %p45_p10 }
  0x52   : > { %s2488_s30 = scalar_select %p2114_p9, 1, 0 }
  0x53   : > { %p2121_p12 = por %p168_p4, %p2489_p11  ;;  %p181_p3 = scmp.lt.s32.totalorder %s1924_s21, 3 }
  0x54   : > { %s2491_s24 = scalar_select %p2125_p0, 1, 0 }
  0x55   : > { %s2490_s17 = scalar_select %p2121_p12, 1, 0 }
  0x56   : > { %p2130_p13 = pnand %p1357_p7, %p181_p3  ;;  %s1930_s9 = smov [#allocation8]  }
  0x57   : > { %s193_s15 = sshll.u32 %s1930_s9, 4  ;;  %s1362_s26 = sshll.u32 %s2009_s27, 5  ;;  %s2134_s15 = int_to_ptr.vmem [resolvable:$true] %s193_s15 }
  0x58   : > { %s2492_s10 = scalar_select %p2130_p13, 1, 0 }
  0x59   : > { %p1591_p1 = pneg %p2130_p13  ;;  %s1441_s28 = sshll.u32 %s1924_s21, 9 }
  0x5a   : > { %s2149_s12 = scalar_lea.hbm %s2461_s2, %s1441_s28  ;;  %s253_s14 = scalar_lea.vmem [#allocation7], %s1362_s26 }
  0x5b   : > { %p2142_p4 = pnand %p1591_p1, %p2471_p2  ;;  %s260_s0 = sshll.u32 %s253_s14, 4  ;;  %s2151_s0 = int_to_ptr.vmem [resolvable:$true] %s260_s0 }
  0x5c   : > { %s1758_s25 = scalar_lea.hbm %s2462_s3, 384 }
  0x5d   : > { %p1759_p10 = scmp.ne.s32.totalorder %s2462_s3, %s1758_s25  ;;  %p1760_p5 = pneg %p2142_p4 }
  0x5e   : > { %p1765_p3 = scmp.lt.u32.totalorder %s1758_s25, %s2462_s3 }
  0x5f   : > { %p1761_p7 = pnand %p1760_p5, %p1759_p10 }
  0x61   : > { %p1762_p11 = pneg %p1761_p7 }
  0x63   : > { %p1767_p1 = pnand %p1765_p3, %p1762_p11 }
  0x65   : > { %1770 = shalt.err (!%p1767_p1)
}
  0x66   : > { %s1771_s14 = scalar_lea.vmem %s2134_s15, 384  ;;  %p1779_p9 = scmp.lt.s32.totalorder %s2134_s15, %s2134_s15 }
  0x67   : > { %p1772_p2 = scmp.ne.s32.totalorder %s2134_s15, %s1771_s14  ;;  %p1780_p13 = scmp.lt.s32.totalorder %s1771_s14, %s1771_s14 }
  0x69   : > { %p1774_p0 = pnand %p1772_p2, %p1760_p5  ;;  %p1781_p6 = por %p1780_p13, %p1779_p9 }
  0x6b   : > { %p1775_p12 = pneg %p1774_p0 }
  0x6d   : > { %p1782_p8 = pnand %p1781_p6, %p1775_p12 }
  0x6f   : > { %1785 = shalt.err (!%p1782_p8)
}
  0x70   : > { %s1931_s1 = smov 128   ;;  %s1932_s20 = smov 8  }
  0x71   : > { %1594 = dma.hbm_to_vmem [thread:$0]  (!%p2142_p4), %s2462_s3, 384, %s2134_s15, [#allocation9], %s1931_s1, %s1931_s1, %s1932_s20  }
  0x72   : > { %s1786_s26 = scalar_lea.hbm %s2149_s12, 512  ;;  %p2494_p0 = scmp.ne.s32.totalorder %s2486_s13, 0 }
  0x73   : > { %p1787_p2 = scmp.ne.s32.totalorder %s2149_s12, %s1786_s26  ;;  %s1791_s23 = scalar_lea.hbm %s2461_s2, 1024 }
  0x74   : > { %p1792_p8 = scmp.lt.u32.totalorder %s2149_s12, %s2461_s2  ;;  %p1793_p12 = scmp.lt.u32.totalorder %s1791_s23, %s1786_s26 }
  0x75   : > { %p1789_p9 = pnand %p1787_p2, %p2494_p0  ;;  %p1795_p10 = scmp.lt.u32.totalorder %s1786_s26, %s2149_s12 }
  0x76   : > { %p1794_p13 = por %p1793_p12, %p1792_p8 }
  0x77   : > { %p1790_p6 = pneg %p1789_p9 }
  0x78   : > { %p1796_p5 = por %p1795_p10, %p1794_p13 }
  0x7a   : > { %p1797_p7 = pnand %p1796_p5, %p1790_p6 }
  0x7c   : > { %1800 = shalt.err (!%p1797_p7)
}
  0x7d   : > { %s1801_s15 = scalar_lea.vmem %s2151_s0, 512  ;;  %s1933_s16 = smov [#allocation7]  }
  0x7e   : > { %p1802_p4 = scmp.ne.s32.totalorder %s2151_s0, %s1801_s15  ;;  %s1806_s1 = sshll.u32 %s1933_s16, 4  ;;  %s1807_s1 = int_to_ptr.vmem [resolvable:$false] %s1806_s1 }
  0x7f   : > { %s1808_s20 = scalar_lea.vmem %s1807_s1, 1024  ;;  %p1809_p1 = scmp.lt.s32.totalorder %s2151_s0, %s1807_s1 }
  0x80   : > { %p1804_p11 = pnand %p1802_p4, %p2494_p0  ;;  %p1810_p2 = scmp.lt.s32.totalorder %s1808_s20, %s1801_s15 }
  0x82   : > { %p1805_p3 = pneg %p1804_p11  ;;  %p1811_p9 = por %p1810_p2, %p1809_p1 }
  0x84   : > { %p1812_p8 = pnand %p1811_p9, %p1805_p3 }
  0x86   : > { %1815 = shalt.err (!%p1812_p8)
}
  0x87   : > { %p2495_p6 = scmp.ne.s32.totalorder %s2484_s29, 0  ;;  %s2496_s22 = smov 4  }
  0x88   : > { %s2497_s25 = smov 64   ;;  %s1365_s26 = sshll.u32 %s2009_s27, 2 }
  0x89   : > { %1604 = dma.hbm_to_vmem [thread:$0]  (!%p2495_p6), %s2149_s12, 512, %s2151_s0, %s2076_s6, %s2497_s25, %s2497_s25, %s2496_s22  }
  0x8a   : > { %s1366_s28 = sshll.u32 %s1924_s21, 6  ;;  %s274_s14 = scalar_lea.vmem [#allocation10], %s1365_s26 }
  0x8b   : > { %s2204_s8 = scalar_lea.hbm %s2463_s4, %s1366_s28  ;;  %s281_s15 = sshll.u32 %s274_s14, 4  ;;  %s282_s15 = int_to_ptr.vmem [resolvable:$true] %s281_s15 }
  0x8c   : > { %s1816_s16 = scalar_lea.hbm %s2204_s8, 64  ;;  %s1821_s12 = scalar_lea.hbm %s2463_s4, 128 }
  0x8d   : > { %p1817_p12 = scmp.ne.s32.totalorder %s2204_s8, %s1816_s16  ;;  %p1822_p5 = scmp.lt.u32.totalorder %s2204_s8, %s2463_s4 }
  0x8e   : > { %p1823_p7 = scmp.lt.u32.totalorder %s1821_s12, %s1816_s16  ;;  %p1825_p11 = scmp.lt.u32.totalorder %s1816_s16, %s2204_s8 }
  0x8f   : > { %p1819_p13 = pnand %p1817_p12, %p2494_p0 }
  0x90   : > { %p1824_p4 = por %p1823_p7, %p1822_p5 }
  0x91   : > { %p1820_p10 = pneg %p1819_p13 }
  0x92   : > { %p1826_p3 = por %p1825_p11, %p1824_p4 }
  0x94   : > { %p1827_p1 = pnand %p1826_p3, %p1820_p10 }
  0x96   : > { %1830 = shalt.err (!%p1827_p1)
}
  0x97   : > { %s1831_s20 = scalar_lea.vmem %s282_s15, 64  ;;  %s1934_s22 = smov [#allocation10]  }
  0x98   : > { %p1832_p2 = scmp.ne.s32.totalorder %s282_s15, %s1831_s20  ;;  %s1836_s25 = sshll.u32 %s1934_s22, 4  ;;  %s1837_s25 = int_to_ptr.vmem [resolvable:$false] %s1836_s25 }
  0x99   : > { %s1838_s26 = scalar_lea.vmem %s1837_s25, 128  ;;  %p1839_p12 = scmp.lt.s32.totalorder %s282_s15, %s1837_s25 }
  0x9a   : > { %p1834_p9 = pnand %p1832_p2, %p2494_p0  ;;  %p1840_p13 = scmp.lt.s32.totalorder %s1838_s26, %s1831_s20 }
  0x9c   : > { %p1835_p8 = pneg %p1834_p9  ;;  %p1841_p6 = por %p1840_p13, %p1839_p12 }
  0x9e   : > { %p1842_p5 = pnand %p1841_p6, %p1835_p8 }
  0xa0   : > { %1845 = shalt.err (!%p1842_p5)
}
  0xa1   : > { %p2498_p7 = scmp.ne.s32.totalorder %s2484_s29, 0  ;;  %p2499_p10 = scmp.ne.s32.totalorder %s2492_s10, 0 }
  0xa2   : > { %s292_s13 = sand.u32 (!%p2499_p10), 1, %s2104_s7   ;;  %s2228_s28 = sand.u32 (!%p2499_p10), 1, %s1916_s19  }
  0xa3   : > { %1607 = dma.hbm_to_vmem [thread:$0]  (!%p2498_p7), %s2204_s8, 64, %s282_s15, %s2030_s11  }
  0xa4   : > { %290 = sbr.rel (%p2499_p10) target bundleno = 1391 (0x56f), region = 40  ;;  %s293_s23 = scalar_lea.sflag (!%p2499_p10), [#allocation3], %s292_s13 }
  0xa5   : > { %s2231_s9 = smul.u32 (!%p2499_p10), 96, %s2228_s28  ;;  %p2500_p0 = scmp.ne.s32.totalorder (!%p2499_p10), %s2488_s30, 0 }
  0xa7   : > { %s2234_s14 = scalar_lea.vmem (!%p2499_p10), [#allocation2], %s2231_s9 }
  0xab   : > { %1891 = dma.done.wait (%p2500_p0), %s293_s23, 1536  }
  0xac   : > { %1893 = vsyncadd (%p2500_p0), %s293_s23, 4294965760  ;;  %s302_s29 = scalar_lea.sflag [#allocation6], %s292_s13  ;;  %s2241_s11 = scalar_lea.vmem [#allocation5], %s2231_s9 }
  0xad   : > { %1895 = dma.done.wait (%p2500_p0), %s302_s29, 2048  }
  0xae   : > { %1897 = vsyncadd (%p2500_p0), %s302_s29, 4294965248  ;;  %s1368_s10 = sshll.u32 %s2228_s28, 5  ;;  %p2501_p6 = scmp.eq.s32.totalorder %s2104_s7, 0 }
  0xaf   : > { %s2248_s8 = scalar_lea.vmem [#allocation7], %s1368_s10 }
  0xb0   : > { %1899 = dma.done.wait (%p2501_p6), [#allocation9], 384   ;;  %p2502_p4 = pmov %p2501_p6 }
  0xb1   : > { %s1370_s15 = sshll.u32 %s2228_s28, 2 }
  0xb2   : > { %1901 = vsyncadd (%p2502_p4), [#allocation9], 4294966912  ;;  %s2255_s16 = scalar_lea.vmem [#allocation10], %s1370_s15 }
  0xb3   : > { %1903 = dma.done.wait (%p2500_p0), %s293_s23, 64  }
  0xb4   : > { %1905 = vsyncadd (%p2500_p0), %s293_s23, 4294967232  ;;  %v1935_v0 = vmov 0.0   ;;  %vm1936_vm0 = vmmov 0   ;;  %v1658_v1 = vld [vmem:[%s2234_s14] sm:$0xff]   ;;  %v1659_v2 = vld [vmem:[%s2234_s14 + $0x8] sm:$0xff]   ;;  %vm458_vm1 = vcmask 523264  }
  0xb5   : > { %1496 = vmatprep.subr.bf16.mxu0 %v1935_v0  ;;  %1504 = vmatprep.mubr.msk.bf16.mxu0 %vm1936_vm0, %v1935_v0  ;;  %v1662_v3 = vld [vmem:[%s2241_s11] sm:$0xff]   ;;  %v1660_v4 = vld [vmem:[%s2234_s14 + $0x10] sm:$0xff]   ;;  %v1663_v5 = vld [vmem:[%s2241_s11 + $0x8] sm:$0xff]   ;;  %vm503_vm2 = vcmask 64512   ;;  %vm564_vm3 = vcmask 1043456   ;;  %vm665_vm4 = vcmask 60416  }
  0xb6   : > { %418 = vxpose.xlu0.c.b16.start [1/4] (short) (narrow) %v1658_v1, 16  ;;  %1497 = vmatpush3.bf16.msra.mxu0 %v1662_v3  ;;  %v1666_v6 = vld [vmem:[%s2234_s14 + $0x20] sm:$0xff]   ;;  %v1661_v7 = vld [vmem:[%s2234_s14 + $0x18] sm:$0xff]   ;;  %v1664_v8 = vld [vmem:[%s2241_s11 + $0x10] sm:$0xff]   ;;  %s2326_s0 = scalar_lea.vmem [#allocation11], %s2231_s9  ;;  %s1576_s6 = smul.u32 1536, %s2104_s7 }
  0xb7   : > { %1498 = vmatprep.subr.bf16.mxu0 %v1935_v0  ;;  %714 = vxpose.xlu1.c.b16.start [1/4] (short) (narrow) %v1666_v6, 16  ;;  %v1667_v9 = vld [vmem:[%s2234_s14 + $0x28] sm:$0xff]   ;;  %v1665_v10 = vld [vmem:[%s2241_s11 + $0x18] sm:$0xff]   ;;  %v1668_v11 = vld [vmem:[%s2234_s14 + $0x30] sm:$0xff]   ;;  %s1210_s1 = sshll.u32 %s2326_s0, 4  ;;  %s1197_s7 = scalar_lea.sflag [#allocation4], %s2228_s28  ;;  %s2409_s1 = int_to_ptr.vmem [resolvable:$true] %s1210_s1 }
  0xb8   : > { %v1669_v12 = vld [vmem:[%s2234_s14 + $0x38] sm:$0xff]   ;;  %v2282_v15 = vld [vmem:[%s2248_s8] sm:$0xff]   ;;  %v1679_v17 = vld [vmem:[%s2234_s14 + $0x48] sm:$0xff]   ;;  %s2407_s25 = scalar_lea.hbm %s2464_s5, %s1576_s6  ;;  %s1846_s26 = scalar_lea.vmem %s2409_s1, 1536 }
  0xb9   : > { %v523_v14 = vld [vmem:[%s2255_s16] sm:$0x1]  ;;  %1510 = vmatprep.mubr.msk.bf16.mxu1 %vm503_vm2, %v2282_v15  ;;  %v1678_v16 = vld [vmem:[%s2234_s14 + $0x40] sm:$0xff]   ;;  %v2295_v48 = vld [vmem:[%s2248_s8 + $0x8] sm:$0xff]   ;;  %p1847_p11 = scmp.ne.s32.totalorder %s2409_s1, %s1846_s26  ;;  %p2503_p3 = scmp.ne.s32.totalorder %s2490_s17, 0 }
  0xba   : > { %419 = vxpose.xlu0.c.b16.cont [2/4] (short) (narrow) %v1659_v2, 16  ;;  %1499 = vmatpush3.bf16.msra.mxu0 %v1663_v5  ;;  %1570 = vpush %v523_v14  ;;  %v529_v43 = vld [vmem:[#allocation8] sm:$0xff]  ;;  %v2299_v50 = vld [vmem:[%s2248_s8 + $0x10] sm:$0xff]   ;;  %v1673_v51 = vld [vmem:[%s2241_s11 + $0x28] sm:$0xff]   ;;  %s1937_s13 = smov [#allocation11]  }
  0xbb   : > { %1500 = vmatprep.subr.bf16.mxu0 %v1935_v0  ;;  %715 = vxpose.xlu1.c.b16.cont [2/4] (short) (narrow) %v1667_v9, 16  ;;  %v1672_v49 = vld [vmem:[%s2241_s11 + $0x20] sm:$0xff]   ;;  %v2309_v52 = vld [vmem:[%s2248_s8 + $0x18] sm:$0xff]   ;;  %v1676_v53 = vld [vmem:[%s2241_s11 + $0x30] sm:$0xff]   ;;  %p1848_p1 = pnand %p1847_p11, %p2503_p3  ;;  %s1850_s9 = sshll.u32 %s1937_s13, 4  ;;  %s1851_s9 = int_to_ptr.vmem [resolvable:$false] %s1850_s9 }
  0xbc   : > { %v1677_v54 = vld [vmem:[%s2241_s11 + $0x38] sm:$0xff]   ;;  %v1680_v56 = vld [vmem:[%s2234_s14 + $0x50] sm:$0xff]   ;;  %s1852_s23 = scalar_lea.vmem %s1851_s9, 3072  ;;  %p1853_p9 = scmp.lt.s32.totalorder %s2409_s1, %s1851_s9 }
  0xbd   : > { %v1681_v57 = vld [vmem:[%s2234_s14 + $0x58] sm:$0xff]   ;;  %p1849_p2 = pneg %p1848_p1  ;;  %p1854_p8 = scmp.lt.s32.totalorder %s1852_s23, %s1846_s26 }
  0xbe   : > { %420 = vxpose.xlu0.c.b16.cont [3/4] (short) (narrow) %v1660_v4, 16  ;;  %1501 = vmatpush3.bf16.msra.mxu0 %v1664_v8  ;;  %v817_v58 = vld [vmem:[%s2255_s16 + $0x1] sm:$0x1] }
  0xbf   : > { %1502 = vmatprep.subr.bf16.mxu0 %v1935_v0  ;;  %716 = vxpose.xlu1.c.b16.cont [3/4] (short) (narrow) %v1668_v11, 16  ;;  %1572 = vpush %v817_v58  ;;  %p1855_p12 = por %p1854_p8, %p1853_p9 }
  0xc1   : > { %p1856_p13 = pnand %p1855_p12, %p1849_p2 }
  0xc2   : > { %421 = vxpose.xlu0.c.b16.end [4/4] (short) (narrow) %v1661_v7, 16  ;;  %1503 = vmatpush3.bf16.msra.mxu0 %v1665_v10 }
  0xc3   : > { %717 = vxpose.xlu1.c.b16.end [4/4] (short) (narrow) %v1669_v12, 16 }
  0xc6   : > { %975 = vxpose.xlu0.c.b16.start [1/4] (short) (narrow) %v1678_v16, 16 }
  0xca   : > { %976 = vxpose.xlu0.c.b16.cont [2/4] (short) (narrow) %v1679_v17, 16 }
  0xce   : > { %977 = vxpose.xlu0.c.b16.cont [3/4] (short) (narrow) %v1680_v56, 16 }
  0xd2   : > { %978 = vxpose.xlu0.c.b16.end [4/4] (short) (narrow) %v1681_v57, 16 }
  0xeb   : > { %s1571_s30 = spop %1570 }
  0xec   : > { %v526_v41 = vstv %s1571_s30 }
  0xf0   : > { %s1573_s27 = spop %1572 }
 0x11c   : > { %v426_v13 = vpop.trf.xlu0 }
 0x11d   : > { %1505 = vmatmul.mubr.msk.bf16.vlgmr.msra.gmra.mrb[0].mxu0 %vm458_vm1, %v426_v13  ;;  %v722_v55 = vpop.trf.xlu1 }
 0x11e   : > { %1554 = vmatprep.mubr.msk.bf16.mxu0 %vm503_vm2, %v2282_v15 }
 0x1f0   : > { %v496_v18 = vpop.f32.mrb[0].mxu0 }
 0x1f1   : > { %v502_v19 = vmul.f32 0.015625, %v496_v18  ;;  %v1506_v20 = vpop.f32.mrb[1].mxu0 }
 0x1f2   : > { %v499_v21 = vpop.f32.mrb[2].mxu0 }
 0x1f3   : > { %v504_v22 = vsel %vm503_vm2, %v502_v19, -inf  ;;  %v1507_v23 = vpop.f32.mrb[3].mxu0 }
 0x1f4   : > { %v505_v24 = vrot.slane %v504_v22, 4 }
 0x1f6   : > { %v506_v25 = vmax.f32 %v504_v22, %v505_v24 }
 0x1f8   : > { %v507_v26 = vrot.slane %v506_v25, 2 }
 0x1fa   : > { %v508_v27 = vmax.f32 %v506_v25, %v507_v26 }
 0x1fc   : > { %v509_v28 = vrot.slane %v508_v27, 1 }
 0x1fe   : > { %v510_v29 = vmax.f32 %v508_v27, %v509_v28 }
 0x200   : > { %v511_v30 = vsub.f32 %v502_v19, %v510_v29 }
 0x202   : > { %v512_v31 = vmul.f32 1.442695, %v511_v30 }
 0x204   : > { %1686 = vpow2.f32 %v512_v31 }
 0x20e   : > { %v1687_v32 = vpop.eup %1686 }
 0x20f   : > { %v514_v33 = vsel %vm503_vm2, %v1687_v32, 0.0 }
 0x210   : > { %v515_v34 = vrot.slane %v514_v33, 4 }
 0x212   : > { %v516_v35 = vadd.f32 %v515_v34, %v514_v33 }
 0x214   : > { %v517_v36 = vrot.slane %v516_v35, 2 }
 0x216   : > { %v518_v37 = vadd.f32 %v517_v36, %v516_v35  ;;  %v820_v35 = vstv %s1573_s27 }
 0x218   : > { %v519_v38 = vrot.slane %v518_v37, 1 }
 0x21a   : > { %v520_v39 = vadd.f32 %v519_v38, %v518_v37  ;;  %v824_v37 = vld [vmem:[#allocation8 + $0x8] sm:$0xff] }
 0x21c   : > { %1688 = vrcp.f32 %v520_v39 }
 0x226   : > { %v1689_v40 = vpop.eup %1688 }
 0x227   : > { %v522_v42 = vmul.f32 %v1689_v40, %v1687_v32 }
 0x229   : > { %v528_v44 = vmul.f32 %v526_v41, %v522_v42  ;;  %v1682_v42 = vld [vmem:[%s2241_s11 + $0x40] sm:$0xff]  }
 0x22b   : > { %v530_v45 = vadd.f32 %v529_v43, %v528_v44  ;;  %v1683_v43 = vld [vmem:[%s2241_s11 + $0x48] sm:$0xff]   ;;  %v1684_v44 = vld [vmem:[%s2241_s11 + $0x50] sm:$0xff]  }
 0x22d   : > { %v531_v46 = vpack.c.bf16 %v530_v45, %v530_v45  ;;  %v1685_v45 = vld [vmem:[%s2241_s11 + $0x58] sm:$0xff]  }
 0x22f   : > { %1562 = vmatprep.subr.msk.bf16.mxu1 %vm564_vm3, %v531_v46  ;;  %v566_v47 = vsel %vm564_vm3, %v531_v46, 0  ;;  %v983_v46 = vpop.trf.xlu0 }
 0x230   : > { %1509 = vmatpush3.bf16.msra.mxu1 %v566_v47  ;;  %v1078_v47 = vld [vmem:[%s2255_s16 + $0x2] sm:$0x1] }
 0x231   : > { %1518 = vmatprep.subr.bf16.mxu1 %v1935_v0  ;;  %1574 = vpush %v1078_v47 }
 0x233   : > { %1511 = vmatmul.mubr.msk.bf16.vlgmr.msra.gmra.mrb[0].mxu1 %vm503_vm2, %v2295_v48 }
 0x234   : > { %1519 = vmatpush3.bf16.msra.mxu1 %v1672_v49  ;;  %1514 = vmatprep.mubr.msk.bf16.mxu1 %vm503_vm2, %v2299_v50 }
 0x235   : > { %1520 = vmatprep.subr.bf16.mxu1 %v1935_v0 }
 0x238   : > { %1521 = vmatpush3.bf16.msra.mxu1 %v1673_v51 }
 0x239   : > { %1522 = vmatprep.subr.bf16.mxu1 %v1935_v0 }
 0x23b   : > { %1515 = vmatmul.mubr.msk.bf16.gmra.mrb[4].mxu1 %vm503_vm2, %v2309_v52 }
 0x23c   : > { %1523 = vmatpush3.bf16.msra.mxu1 %v1676_v53  ;;  %1526 = vmatprep.mubr.msk.bf16.mxu1 %vm1936_vm0, %v1935_v0 }
 0x23d   : > { %1524 = vmatprep.subr.bf16.mxu1 %v1935_v0 }
 0x240   : > { %1525 = vmatpush3.bf16.msra.mxu1 %v1677_v54 }
 0x243   : > { %1527 = vmatmul.mubr.msk.bf16.vlgmr.msra.gmra.mrb[8].mxu1 %vm458_vm1, %v722_v55 }
 0x244   : > { %1532 = vmatprep.mubr.msk.bf16.mxu1 %vm503_vm2, %v2282_v15 }
 0x262   : > { %s1575_s12 = spop %1574 }
 0x306   : > { %v1512_v59 = vpop.f32.mrb[0].mxu1 }
 0x307   : > { %v1444_v60 = vpack.c.bf16 %v1512_v59, %v1512_v59  ;;  %v602_v61 = vpop.f32.mrb[1].mxu1 }
 0x308   : > { %v1442_v62 = vpack.c.bf16 %v602_v61, %v602_v61  ;;  %v1513_v63 = vpop.f32.mrb[2].mxu1 }
 0x309   : > { %668 = vst.msk [vmem:[%s2326_s0 + $0x8] sm:$0xf] %vm665_vm4, %v1444_v60  ;;  %v1445_v1 = vpack.c.bf16 %v1513_v63, %v1513_v63  ;;  %v605_v2 = vpop.f32.mrb[3].mxu1 }
 0x30a   : > { %666 = vst.msk [vmem:[%s2326_s0] sm:$0xf] %vm665_vm4, %v1442_v62  ;;  %v1443_v3 = vpack.c.bf16 %v605_v2, %v605_v2 }
 0x30b   : > { %669 = vst.msk [vmem:[%s2326_s0 + $0xc] sm:$0xf] %vm665_vm4, %v1445_v1 }
 0x30c   : > { %667 = vst.msk [vmem:[%s2326_s0 + $0x4] sm:$0xf] %vm665_vm4, %v1443_v3 }
 0x30e   : > { %v1516_v4 = vpop.f32.mrb[4].mxu1 }
 0x30f   : > { %v1448_v5 = vpack.c.bf16 %v1516_v4, %v1516_v4  ;;  %v618_v6 = vpop.f32.mrb[5].mxu1 }
 0x310   : > { %v1446_v7 = vpack.c.bf16 %v618_v6, %v618_v6  ;;  %v1517_v8 = vpop.f32.mrb[6].mxu1 }
 0x311   : > { %672 = vst.msk [vmem:[%s2326_s0 + $0x18] sm:$0xf] %vm665_vm4, %v1448_v5  ;;  %v1449_v9 = vpack.c.bf16 %v1517_v8, %v1517_v8  ;;  %v621_v10 = vpop.f32.mrb[7].mxu1 }
 0x312   : > { %670 = vst.msk [vmem:[%s2326_s0 + $0x10] sm:$0xf] %vm665_vm4, %v1446_v7  ;;  %v1447_v11 = vpack.c.bf16 %v621_v10, %v621_v10 }
 0x313   : > { %673 = vst.msk [vmem:[%s2326_s0 + $0x1c] sm:$0xf] %vm665_vm4, %v1449_v9 }
 0x314   : > { %671 = vst.msk [vmem:[%s2326_s0 + $0x14] sm:$0xf] %vm665_vm4, %v1447_v11 }
 0x316   : > { %v791_v12 = vpop.f32.mrb[8].mxu1 }
 0x317   : > { %v797_v13 = vmul.f32 0.015625, %v791_v12  ;;  %v1528_v14 = vpop.f32.mrb[9].mxu1 }
 0x318   : > { %v794_v15 = vpop.f32.mrb[10].mxu1 }
 0x319   : > { %v798_v16 = vsel %vm503_vm2, %v797_v13, -inf  ;;  %v1529_v17 = vpop.f32.mrb[11].mxu1 }
 0x31a   : > { %v799_v18 = vrot.slane %v798_v16, 4 }
 0x31c   : > { %v800_v19 = vmax.f32 %v798_v16, %v799_v18 }
 0x31e   : > { %v801_v20 = vrot.slane %v800_v19, 2 }
 0x320   : > { %v802_v21 = vmax.f32 %v800_v19, %v801_v20 }
 0x322   : > { %v803_v22 = vrot.slane %v802_v21, 1 }
 0x324   : > { %v804_v23 = vmax.f32 %v802_v21, %v803_v22 }
 0x326   : > { %v805_v24 = vsub.f32 %v797_v13, %v804_v23 }
 0x328   : > { %v806_v25 = vmul.f32 1.442695, %v805_v24 }
 0x32a   : > { %1690 = vpow2.f32 %v806_v25 }
 0x334   : > { %v1691_v26 = vpop.eup %1690 }
 0x335   : > { %v808_v27 = vsel %vm503_vm2, %v1691_v26, 0.0 }
 0x336   : > { %v809_v28 = vrot.slane %v808_v27, 4 }
 0x338   : > { %v810_v29 = vadd.f32 %v809_v28, %v808_v27  ;;  %v1085_v28 = vld [vmem:[#allocation8 + $0x10] sm:$0xff] }
 0x33a   : > { %v811_v30 = vrot.slane %v810_v29, 2 }
 0x33c   : > { %v812_v31 = vadd.f32 %v811_v30, %v810_v29 }
 0x33e   : > { %v813_v32 = vrot.slane %v812_v31, 1 }
 0x340   : > { %v814_v33 = vadd.f32 %v813_v32, %v812_v31 }
 0x342   : > { %1692 = vrcp.f32 %v814_v33 }
 0x34c   : > { %v1693_v34 = vpop.eup %1692 }
 0x34d   : > { %v816_v36 = vmul.f32 %v1693_v34, %v1691_v26  ;;  %v1081_v26 = vstv %s1575_s12 }
 0x34f   : > { %v822_v38 = vmul.f32 %v820_v35, %v816_v36 }
 0x351   : > { %v825_v39 = vadd.f32 %v824_v37, %v822_v38 }
 0x353   : > { %v826_v40 = vpack.c.bf16 %v825_v39, %v825_v39 }
 0x355   : > { %1563 = vmatprep.subr.msk.bf16.mxu1 %vm564_vm3, %v826_v40  ;;  %v828_v41 = vsel %vm564_vm3, %v826_v40, 0 }
 0x356   : > { %1531 = vmatpush3.bf16.msra.mxu1 %v828_v41 }
 0x357   : > { %1540 = vmatprep.subr.bf16.mxu1 %v1935_v0 }
 0x359   : > { %1533 = vmatmul.mubr.msk.bf16.vlgmr.msra.gmra.mrb[12].mxu1 %vm503_vm2, %v2295_v48 }
 0x35a   : > { %1541 = vmatpush3.bf16.msra.mxu1 %v1682_v42  ;;  %1536 = vmatprep.mubr.msk.bf16.mxu1 %vm503_vm2, %v2299_v50 }
 0x35b   : > { %1542 = vmatprep.subr.bf16.mxu1 %v1935_v0 }
 0x35e   : > { %1543 = vmatpush3.bf16.msra.mxu1 %v1683_v43 }
 0x35f   : > { %1544 = vmatprep.subr.bf16.mxu1 %v1935_v0 }
 0x361   : > { %1537 = vmatmul.mubr.msk.bf16.gmra.mrb[16].mxu1 %vm503_vm2, %v2309_v52 }
 0x362   : > { %1545 = vmatpush3.bf16.msra.mxu1 %v1684_v44  ;;  %1548 = vmatprep.mubr.msk.bf16.mxu1 %vm1936_vm0, %v1935_v0 }
 0x363   : > { %1546 = vmatprep.subr.bf16.mxu1 %v1935_v0 }
 0x366   : > { %1547 = vmatpush3.bf16.msra.mxu1 %v1685_v45 }
 0x369   : > { %1549 = vmatmul.mubr.msk.bf16.vlgmr.msra.gmra.mrb[20].mxu1 %vm458_vm1, %v983_v46 }
 0x42c   : > { %v1534_v49 = vpop.f32.mrb[12].mxu1 }
 0x42d   : > { %v1452_v51 = vpack.c.bf16 %v1534_v49, %v1534_v49  ;;  %v864_v53 = vpop.f32.mrb[13].mxu1 }
 0x42e   : > { %v1450_v54 = vpack.c.bf16 %v864_v53, %v864_v53  ;;  %v1535_v55 = vpop.f32.mrb[14].mxu1 }
 0x42f   : > { %929 = vst.msk [vmem:[%s2326_s0 + $0x28] sm:$0xf] %vm665_vm4, %v1452_v51  ;;  %v1453_v56 = vpack.c.bf16 %v1535_v55, %v1535_v55  ;;  %v867_v0 = vpop.f32.mrb[15].mxu1 }
 0x430   : > { %927 = vst.msk [vmem:[%s2326_s0 + $0x20] sm:$0xf] %vm665_vm4, %v1450_v54  ;;  %v1451_v57 = vpack.c.bf16 %v867_v0, %v867_v0 }
 0x431   : > { %930 = vst.msk [vmem:[%s2326_s0 + $0x2c] sm:$0xf] %vm665_vm4, %v1453_v56 }
 0x432   : > { %928 = vst.msk [vmem:[%s2326_s0 + $0x24] sm:$0xf] %vm665_vm4, %v1451_v57 }
 0x434   : > { %v1538_v58 = vpop.f32.mrb[16].mxu1 }
 0x435   : > { %v1456_v59 = vpack.c.bf16 %v1538_v58, %v1538_v58  ;;  %v880_v60 = vpop.f32.mrb[17].mxu1 }
 0x436   : > { %v1454_v61 = vpack.c.bf16 %v880_v60, %v880_v60  ;;  %v1539_v62 = vpop.f32.mrb[18].mxu1 }
 0x437   : > { %933 = vst.msk [vmem:[%s2326_s0 + $0x38] sm:$0xf] %vm665_vm4, %v1456_v59  ;;  %v1457_v63 = vpack.c.bf16 %v1539_v62, %v1539_v62  ;;  %v883_v1 = vpop.f32.mrb[19].mxu1 }
 0x438   : > { %931 = vst.msk [vmem:[%s2326_s0 + $0x30] sm:$0xf] %vm665_vm4, %v1454_v61  ;;  %v1455_v2 = vpack.c.bf16 %v883_v1, %v883_v1 }
 0x439   : > { %934 = vst.msk [vmem:[%s2326_s0 + $0x3c] sm:$0xf] %vm665_vm4, %v1457_v63 }
 0x43a   : > { %932 = vst.msk [vmem:[%s2326_s0 + $0x34] sm:$0xf] %vm665_vm4, %v1455_v2 }
 0x43c   : > { %v1052_v3 = vpop.f32.mrb[20].mxu1 }
 0x43d   : > { %v1058_v4 = vmul.f32 0.015625, %v1052_v3  ;;  %v1550_v5 = vpop.f32.mrb[21].mxu1 }
 0x43e   : > { %v1055_v6 = vpop.f32.mrb[22].mxu1 }
 0x43f   : > { %v1059_v7 = vsel %vm503_vm2, %v1058_v4, -inf  ;;  %v1551_v8 = vpop.f32.mrb[23].mxu1 }
 0x440   : > { %v1060_v9 = vrot.slane %v1059_v7, 4 }
 0x442   : > { %v1061_v10 = vmax.f32 %v1059_v7, %v1060_v9 }
 0x444   : > { %v1062_v11 = vrot.slane %v1061_v10, 2 }
 0x446   : > { %v1063_v12 = vmax.f32 %v1061_v10, %v1062_v11 }
 0x448   : > { %v1064_v13 = vrot.slane %v1063_v12, 1 }
 0x44a   : > { %v1065_v14 = vmax.f32 %v1063_v12, %v1064_v13 }
 0x44c   : > { %v1066_v15 = vsub.f32 %v1058_v4, %v1065_v14 }
 0x44e   : > { %v1067_v16 = vmul.f32 1.442695, %v1066_v15 }
 0x450   : > { %1694 = vpow2.f32 %v1067_v16 }
 0x45a   : > { %v1695_v17 = vpop.eup %1694 }
 0x45b   : > { %v1069_v18 = vsel %vm503_vm2, %v1695_v17, 0.0 }
 0x45c   : > { %v1070_v19 = vrot.slane %v1069_v18, 4 }
 0x45e   : > { %v1071_v20 = vadd.f32 %v1070_v19, %v1069_v18 }
 0x460   : > { %v1072_v21 = vrot.slane %v1071_v20, 2 }
 0x462   : > { %v1073_v22 = vadd.f32 %v1072_v21, %v1071_v20 }
 0x464   : > { %v1074_v23 = vrot.slane %v1073_v22, 1 }
 0x466   : > { %v1075_v24 = vadd.f32 %v1074_v23, %v1073_v22 }
 0x468   : > { %1696 = vrcp.f32 %v1075_v24 }
 0x472   : > { %v1697_v25 = vpop.eup %1696 }
 0x473   : > { %v1077_v27 = vmul.f32 %v1697_v25, %v1695_v17 }
 0x475   : > { %v1083_v29 = vmul.f32 %v1081_v26, %v1077_v27 }
 0x477   : > { %v1086_v30 = vadd.f32 %v1085_v28, %v1083_v29 }
 0x479   : > { %v1087_v31 = vpack.c.bf16 %v1086_v30, %v1086_v30 }
 0x47b   : > { %1564 = vmatprep.subr.msk.bf16.mxu0 %vm564_vm3, %v1087_v31  ;;  %v1089_v32 = vsel %vm564_vm3, %v1087_v31, 0 }
 0x47c   : > { %1553 = vmatpush3.bf16.msra.mxu0 %v1089_v32 }
 0x47f   : > { %1555 = vmatmul.mubr.msk.bf16.vlgmr.msra.gmra.mrb[4].mxu0 %vm503_vm2, %v2295_v48 }
 0x480   : > { %1558 = vmatprep.mubr.msk.bf16.mxu0 %vm503_vm2, %v2299_v50 }
 0x487   : > { %1559 = vmatmul.mubr.msk.bf16.gmra.mrb[8].mxu0 %vm503_vm2, %v2309_v52 }
 0x552   : > { %v1556_v33 = vpop.f32.mrb[4].mxu0 }
 0x553   : > { %v1460_v34 = vpack.c.bf16 %v1556_v33, %v1556_v33  ;;  %v1125_v35 = vpop.f32.mrb[5].mxu0 }
 0x554   : > { %v1458_v36 = vpack.c.bf16 %v1125_v35, %v1125_v35  ;;  %v1557_v37 = vpop.f32.mrb[6].mxu0 }
 0x555   : > { %1190 = vst.msk [vmem:[%s2326_s0 + $0x48] sm:$0xf] %vm665_vm4, %v1460_v34  ;;  %v1461_v38 = vpack.c.bf16 %v1557_v37, %v1557_v37  ;;  %v1128_v39 = vpop.f32.mrb[7].mxu0 }
 0x556   : > { %1188 = vst.msk [vmem:[%s2326_s0 + $0x40] sm:$0xf] %vm665_vm4, %v1458_v36  ;;  %v1459_v48 = vpack.c.bf16 %v1128_v39, %v1128_v39 }
 0x557   : > { %1191 = vst.msk [vmem:[%s2326_s0 + $0x4c] sm:$0xf] %vm665_vm4, %v1461_v38 }
 0x558   : > { %1189 = vst.msk [vmem:[%s2326_s0 + $0x44] sm:$0xf] %vm665_vm4, %v1459_v48 }
 0x55a   : > { %v1560_v50 = vpop.f32.mrb[8].mxu0 }
 0x55b   : > { %v1464_v52 = vpack.c.bf16 %v1560_v50, %v1560_v50  ;;  %v1141_v40 = vpop.f32.mrb[9].mxu0 }
 0x55c   : > { %v1462_v41 = vpack.c.bf16 %v1141_v40, %v1141_v40  ;;  %v1561_v42 = vpop.f32.mrb[10].mxu0 }
 0x55d   : > { %1194 = vst.msk [vmem:[%s2326_s0 + $0x58] sm:$0xf] %vm665_vm4, %v1464_v52  ;;  %v1465_v43 = vpack.c.bf16 %v1561_v42, %v1561_v42  ;;  %v1144_v44 = vpop.f32.mrb[11].mxu0 }
 0x55e   : > { %1192 = vst.msk [vmem:[%s2326_s0 + $0x50] sm:$0xf] %vm665_vm4, %v1462_v41  ;;  %v1463_v45 = vpack.c.bf16 %v1144_v44, %v1144_v44 }
 0x55f   : > { %1195 = vst.msk [vmem:[%s2326_s0 + $0x5c] sm:$0xf] %vm665_vm4, %v1465_v43 }
 0x560   : > { %1193 = vst.msk [vmem:[%s2326_s0 + $0x54] sm:$0xf] %vm665_vm4, %v1463_v45 }
 0x561   : > { %1859 = shalt.err (!%p1856_p13)
}
 0x562   : > { %s1860_s14 = scalar_lea.hbm %s2407_s25, 1536  ;;  %s1864_s10 = scalar_lea.hbm %s2464_s5, 3072 }
 0x563   : > { %p1861_p5 = scmp.ne.s32.totalorder %s2407_s25, %s1860_s14  ;;  %p1865_p0 = scmp.lt.u32.totalorder %s2407_s25, %s2464_s5 }
 0x564   : > { %p1866_p6 = scmp.lt.u32.totalorder %s1864_s10, %s1860_s14  ;;  %p1868_p11 = scmp.lt.u32.totalorder %s1860_s14, %s2407_s25 }
 0x565   : > { %p1862_p7 = pnand %p1861_p5, %p2503_p3 }
 0x566   : > { %p1867_p4 = por %p1866_p6, %p1865_p0 }
 0x567   : > { %p1863_p10 = pneg %p1862_p7 }
 0x568   : > { %p1869_p1 = por %p1868_p11, %p1867_p4 }
 0x56a   : > { %p1870_p2 = pnand %p1869_p1, %p1863_p10 }
 0x56c   : > { %1873 = shalt.err (!%p1870_p2)
}
 0x56d   : > { %s1938_s16 = smov 64   ;;  %s1939_s30 = smov 4  }
 0x56e   : > { %1589 = dma.vmem_to_hbm [thread:$0]  (%p2503_p3), %s2409_s1, 1536, %s2407_s25, %s1197_s7, %s1938_s16, %s1938_s16, %s1939_s30  }
 0x56f PF: > { %s1225_s0 = sand.u32 1, %s1912_s18   ;;  %p2504_p9 = scmp.ne.s32.totalorder %s2491_s24, 0 }
 0x570   : > { %p2505_p8 = scmp.ge.s32.totalorder %s1924_s21, 2  ;;  %s1226_s27 = scalar_lea.sflag [#allocation4], %s1225_s0 }
 0x572   : > { %p1609_p12 = pnand %p2505_p8, %p2504_p9 }
 0x574   : > { %1907 = dma.done.wait (!%p1609_p12), %s1226_s27, 1536  }
 0x575   : > { %1909 = vsyncadd (!%p1609_p12), %s1226_s27, 4294965760  ;;  %s2506_s21 = sld [smem:[#allocation18_spill]]  ;;  %s2507_s12 = sld [smem:[#allocation17_spill]] }
 0x576   : > { %s2508_s20 = sld [smem:[#allocation19_spill]]  ;;  %s2509_s18 = smov %s1916_s19 }
 0x57b   : > { %p22_p13 = scmp.ge.s32.totalorder %s2506_s21, 4   ;;  %s2510_s19 = smov %s2507_s12 }
 0x57d   :  { %24 = sbr.rel (!%p22_p13) target bundleno = 11 (0xb), region = 126 }
 0x584   :  { %1231 = vsyncpa [#allocation3], 1 }
 0x585   :  { %1233 = vsyncpa [#allocation3 + $0x1], 1 }
 0x586   :  { %1234 = vsyncpa [#allocation6], 1 }
 0x587   :  { %1236 = vsyncpa [#allocation6 + $0x1], 1 }
 0x588   :  { %1237 = vsyncpa [#allocation9], 1 }
 0x589   :  { %1238 = vsyncpa [#allocation4], 1 }
 0x58a   :  { %1240 = vsyncpa [#allocation4 + $0x1], 1 }

// kernel: unit_gcn_forward.5
= control target key start
LH: loop header
LB: loop body
LE: loop exit
PB: predicated region body
PF: predicated region fallthrough
CT: control target
= control target key end

     0   :  { %s790_s24 = smov 0   ;;  %s792_s25 = smov 0   ;;  %s856_s0 = inlined_call_operand.vmem [shape: bf16[2,12,128], index: 0, kind: input, shape index: {}]   ;;  %s857_s1 = inlined_call_operand.vmem [shape: f32[2,4,128], index: 1, kind: input, shape index: {}]   ;;  %s858_s2 = inlined_call_operand.vmem [shape: bf16[16,12], index: 2, kind: input, shape index: {}]   ;;  %s859_s3 = inlined_call_operand.vmem [shape: f32[2,16,2], index: 3, kind: input, shape index: {}]   ;;  %s860_s4 = inlined_call_operand.vmem [shape: bf16[16,4], index: 4, kind: input, shape index: {}]   ;;  %s861_s5 = inlined_call_operand.vmem [shape: f32[16,1], index: 5, kind: input, shape index: {}]   ;;  %s862_s6 = inlined_call_operand.vmem [shape: f32[16,1], index: 6, kind: input, shape index: {}]   ;;  %s863_s7 = inlined_call_operand.vmem [shape: f32[2,16,128], index: 7, kind: output, shape index: {}]  }
   0x1   :  { %s794_s26 = smov 0  }
   0x2 LB: > { %s29_s27 = sadd.s32 1, %s740_s25  ;;  %p652_p0 = scmp.ge.s32.totalorder %s744_s26, 1  ;;  %s744_s26 = sphi %s794_s26, %s17_s26   ;;  %s740_s25 = sphi %s792_s25, %s865_s25   ;;  %s736_s24 = sphi %s790_s24, %s864_s24  }
   0x3   : > { %p31_p1 = scmp.ge.s32.totalorder %s29_s27, 2  ;;  %p280_p2 = scmp.lt.s32.totalorder %s744_s26, 3 }
   0x5   : > { %s867_s27 = smov (%p31_p1, %s29_s27), 0  ;;  %p281_p3 = pnand %p652_p0, %p280_p2 }
   0x6   : > { %p330_p4 = scmp.lt.s32.totalorder (!%p281_p3), %s736_s24, 1  ;;  %v746_v0 = vmov (!%p281_p3), 0.0   ;;  %vm747_vm0 = vmmov (!%p281_p3), 0   ;;  %v504_v1 = vld [vmem:[%s861_s5] sm:$0xff] (!%p281_p3)  ;;  %v748_v2 = vmov (!%p281_p3), 1   ;;  %v749_v3 = vmov (!%p281_p3), 0  }
   0x7   : > { %284 = sbr.rel (%p281_p3) target bundleno = 248 (0xf8), region = 48  ;;  %674 = vmatprep.subr.bf16.mxu0 (!%p281_p3), %v746_v0  ;;  %680 = vmatprep.subr.bf16.mxu1 (!%p281_p3), %v746_v0  ;;  %vm377_vm1 = vcmask (!%p281_p3), 1045504   ;;  %v505_v4 = vld [vmem:[%s861_s5 + $0x8] sm:$0xff] (!%p281_p3)  ;;  %vm459_vm2 = vcmask (!%p281_p3), 1041408   ;;  %v720_v9 = vld [vmem:[%s858_s2] sm:$0xff] (!%p281_p3)   ;;  %vm373_vm3 = vcmask (!%p281_p3), 97280  }
   0x8   : > { %676 = vmatprep.mubr.msk.bf16.mxu0 (!%p281_p3), %vm747_vm0, %v746_v0  ;;  %682 = vmatprep.mubr.msk.bf16.mxu1 (!%p281_p3), %vm747_vm0, %v746_v0  ;;  %v721_v12 = vld [vmem:[%s860_s4] sm:$0xff] (!%p281_p3)   ;;  %vm455_vm4 = vcmask (!%p281_p3), 31744   ;;  %v519_v15 = vld [vmem:[%s862_s6 + $0x8] sm:$0xff] (!%p281_p3) }
   0x9   : > { %715 = vset.pattern.permute.xlu0 (!%p281_p3), %v748_v2  ;;  %714 = vset.pattern.permute.xlu1 (!%p281_p3), %v749_v3  ;;  %v518_v14 = vld [vmem:[%s862_s6] sm:$0xff] (!%p281_p3) }
   0xa   : > { %508 = vperm.xlu1 (!%p281_p3), %714, %v504_v1  }
   0xe   : > { %s869_s24 = smov (!%p330_p4, %s736_s24), 1  ;;  %513 = vperm.xlu1 %714, %v505_v4  }
   0xf   : > { %s667_s30 = sshll.u32 %s869_s24, 3  ;;  %s655_s8 = sshll.u32 %s869_s24, 2 }
  0x10   : > { %s337_s11 = scalar_lea.vmem %s856_s0, %s667_s30  ;;  %s344_s14 = scalar_lea.vmem %s857_s1, %s655_s8 }
  0x11   : > { %v719_v5 = vld [vmem:[%s337_s11] sm:$0x3f]   ;;  %s668_s17 = sshll.u32 %s869_s24, 4 }
  0x12   : > { %v448_v6 = vld [vmem:[%s344_s14] sm:$0xf]  ;;  %v379_v7 = vsel %vm377_vm1, %v719_v5, 0  ;;  %s349_s22 = scalar_lea.vmem %s859_s3, %s668_s17  ;;  %717 = vset.pattern.permute.xlu1 %v748_v2  ;;  %s357_s12 = scalar_lea.vmem %s863_s7, %s668_s17 }
  0x13   : > { %v449_v8 = vpack.c.bf16 %v448_v6, %v448_v6  ;;  %675 = vmatpush3.bf16.msra.mxu0 %v379_v7  ;;  %v422_v10 = vld [vmem:[%s349_s22] sm:$0xff]  ;;  %v423_v13 = vld [vmem:[%s349_s22 + $0x8] sm:$0xff] }
  0x14   : > { %437 = vperm.xlu0 %715, %v422_v10   ;;  %441 = vperm.xlu1 %717, %v423_v13  }
  0x15   : > { %v461_v11 = vsel %vm459_vm2, %v449_v8, 0 }
  0x16   : > { %681 = vmatpush3.bf16.msra.mxu1 %v461_v11  ;;  %677 = vmatmul.mubr.msk.bf16.vlgmr.msra.gmra.mrb[0].mxu0 %vm373_vm3, %v720_v9 }
  0x18   : > { %716 = vset.pattern.permute.xlu0 %v749_v3  ;;  %718 = vset.pattern.permute.xlu1 %v749_v3 }
  0x19   : > { %683 = vmatmul.mubr.msk.bf16.vlgmr.msra.gmra.mrb[0].mxu1 %vm455_vm4, %v721_v12  ;;  %426 = vperm.xlu0 %716, %v422_v10  }
  0x1a   : > { %522 = vperm.xlu1 %718, %v518_v14  }
  0x1d   : > { %431 = vperm.xlu0 %716, %v423_v13  }
  0x21   : > { %527 = vperm.xlu0 %716, %v519_v15  }
  0x89   : > { %v509_v16 = vpop.permute.xlu1 %508 }
  0x8d   : > { %v514_v18 = vpop.permute.xlu1 %513 }
  0x93   : > { %v438_v17 = vpop.permute.xlu0 %437  ;;  %v442_v20 = vpop.permute.xlu1 %441 }
  0x98   : > { %v427_v19 = vpop.permute.xlu0 %426 }
  0x99   : > { %v523_v25 = vpop.permute.xlu1 %522 }
  0x9c   : > { %v432_v21 = vpop.permute.xlu0 %431 }
  0xa0   : > { %v528_v38 = vpop.permute.xlu0 %527 }
  0xe9   : > { %v415_v22 = vpop.f32.mrb[0].mxu0 }
  0xea   : > { %v434_v23 = vmul.f32 %v427_v19, %v415_v22  ;;  %v678_v24 = vpop.f32.mrb[1].mxu0 }
  0xeb   : > { %v418_v27 = vpop.f32.mrb[2].mxu0 }
  0xec   : > { %v497_v26 = vpop.f32.mrb[0].mxu1  ;;  %v444_v28 = vadd.f32 %v438_v17, %v434_v23  ;;  %v435_v31 = vmul.f32 %v432_v21, %v418_v27  ;;  %v679_v32 = vpop.f32.mrb[3].mxu0 }
  0xed   : > { %v516_v29 = vmul.f32 %v509_v16, %v497_v26  ;;  %v684_v30 = vpop.f32.mrb[1].mxu1 }
  0xee   : > { %v500_v33 = vpop.f32.mrb[2].mxu1  ;;  %v445_v35 = vadd.f32 %v442_v20, %v435_v31 }
  0xef   : > { %v530_v34 = vadd.f32 %v523_v25, %v516_v29  ;;  %v517_v36 = vmul.f32 %v514_v18, %v500_v33  ;;  %v685_v37 = vpop.f32.mrb[3].mxu1 }
  0xf1   : > { %v532_v39 = vadd.f32 %v530_v34, %v444_v28  ;;  %v531_v40 = vadd.f32 %v528_v38, %v517_v36 }
  0xf3   : > { %v534_v41 = vmax.f32 %v532_v39, 0.0  ;;  %v533_v42 = vadd.f32 %v531_v40, %v445_v35 }
  0xf5   : > { %536 = vst [vmem:[%s357_s12] sm:$0xff] %v534_v41  ;;  %v535_v43 = vmax.f32 %v533_v42, 0.0 }
  0xf7   : > { %537 = vst [vmem:[%s357_s12 + $0x8] sm:$0xff] %v535_v43 }
  0xf8 PF: > { %s17_s26 = sadd.s32 1, %s744_s26   ;;  %s864_s24 = smov %s740_s25 }
  0xf9   : > { %p14_p5 = scmp.ge.s32.totalorder %s17_s26, 4   ;;  %s865_s25 = smov %s867_s27 }
  0xfb   :  { %16 = sbr.rel (!%p14_p5) target bundleno = 2 (0x2), region = 84 }

</bundles_post_ra>
